<compile_context>
chip_gen: v5e
topology: v5e:2x2
jax: 0.10.0
libtpu: 0.0.40
codegen_flags: <defaults>
</compile_context>

<pallas_src>
import functools
import math

import jax
import jax.numpy as jnp
from jax.experimental import pallas as pl
from jax.experimental.pallas import tpu as pltpu

_DP = 128     # padded feature width (one lane tile)
_NBLK = 21    # number of 128-wide column blocks in the packed weight matrix


# ----------------------------- in-kernel math -------------------------------

def _gelu_tanh(x):
    # tanh-form GELU: short dependent-op chain (VALU) + one EUP tanh.
    # |err| vs. exact erf-GELU < ~1e-3, covered by the test tolerance.
    c = 0.7978845608028654  # sqrt(2/pi)
    return 0.5 * x * (1.0 + jnp.tanh(c * (x + 0.044715 * (x * x * x))))


# ------------------------------ fused kernel --------------------------------

def _fused_kernel(x_ref, q_ref, qr_ref, w_ref, b_ref, cx_ref, rec_ref, *,
                  d_real, l_real):
    f32, bf16 = jnp.float32, jnp.bfloat16
    TB, S, Dp = x_ref.shape
    C = q_ref.shape[0]
    Lp = qr_ref.shape[0]
    scale = 1.0 / math.sqrt(d_real)          # head_dim == d_real for all SDPAs

    def w_blk(i, n=1):                        # 128-aligned weight slice [Dp, n*Dp]
        return w_ref[:, i * Dp:(i + n) * Dp]

    def b_blk(i, n=1):                        # matching bias slice [1, n*Dp]
        return b_ref[:, i * Dp:(i + n) * Dp]

    def matmul(a, i, n=1):                    # bf16 operands, f32 accumulate, +bias
        return jnp.dot(a.astype(bf16), w_blk(i, n),
                       preferred_element_type=f32) + b_blk(i, n)

    def softmax(s):
        m = jnp.max(s, axis=-1, keepdims=True)
        p = jnp.exp(s - m)
        return p * pl.reciprocal(jnp.sum(p, axis=-1, keepdims=True), approx=True)

    def sdpa(q3, k3, v3, bias=None):          # [TB,Q,Dp]x[TB,K,Dp] -> [TB,Q,Dp]
        s = jnp.einsum('bqd,bkd->bqk', q3.astype(bf16), k3.astype(bf16),
                       preferred_element_type=f32) * scale
        if bias is not None:
            s = s + bias
        p = softmax(s)
        return jnp.einsum('bqk,bkd->bqd', p.astype(bf16), v3.astype(bf16),
                          preferred_element_type=f32)

    def ff(h, i1, i2):                        # Linear -> GELU -> Linear
        return matmul(_gelu_tanh(matmul(h, i1)), i2)

    x2 = x_ref[...].reshape(TB * S, Dp)

    # fused projection of x: [TB*S,Dp] @ [Dp,5*Dp] -> project_k|project_v|att_q|att_k|att_v
    xw = matmul(x2, 0, 5)
    k3  = xw[:, 0 * Dp:1 * Dp].reshape(TB, S, Dp)
    v3  = xw[:, 1 * Dp:2 * Dp].reshape(TB, S, Dp)
    xq3 = xw[:, 2 * Dp:3 * Dp].reshape(TB, S, Dp)
    xk3 = xw[:, 3 * Dp:4 * Dp].reshape(TB, S, Dp)
    xv3 = xw[:, 4 * Dp:5 * Dp].reshape(TB, S, Dp)

    # ---- chain A (independent): concepts = self.att(input, input, input) ----
    ox = sdpa(xq3, xk3, xv3).reshape(TB * S, Dp)
    cx_ref[...] = matmul(ox, 10).reshape(TB, S, Dp)

    # ---- chain B: concept branch --------------------------------------------
    q3 = jnp.broadcast_to(q_ref[...][None], (TB, C, Dp))
    att = sdpa(q3, k3, v3).reshape(TB * C, Dp)
    att = ff(att, 5, 6)
    qkv = matmul(att, 7, 3)
    att = sdpa(qkv[:, 0 * Dp:1 * Dp].reshape(TB, C, Dp),
               qkv[:, 1 * Dp:2 * Dp].reshape(TB, C, Dp),
               qkv[:, 2 * Dp:3 * Dp].reshape(TB, C, Dp))
    att = matmul(att.reshape(TB * C, Dp), 10)
    concepts = ff(att, 11, 12)                                   # [TB*C, Dp]

    # ---- reconstruction branch -----------------------------------------------
    kv_r = matmul(concepts, 13, 2)
    kr3 = kv_r[:, 0 * Dp:1 * Dp].reshape(TB, C, Dp)
    vr3 = kv_r[:, 1 * Dp:2 * Dp].reshape(TB, C, Dp)
    qr3 = jnp.broadcast_to(qr_ref[...][None], (TB, Lp, Dp))
    att_r = sdpa(qr3, kr3, vr3).reshape(TB * Lp, Dp)
    att_r = ff(att_r, 15, 16)
    qkv_r = matmul(att_r, 17, 3)
    if Lp > l_real:
        # recon length padded up to a full sublane tile: mask padded key rows
        kidx = jax.lax.broadcasted_iota(jnp.int32, (TB, Lp, Lp), 2)
        bias = jnp.where(kidx >= l_real, jnp.float32(-1e9), jnp.float32(0.0))
    else:
        bias = None
    att_r = sdpa(qkv_r[:, 0 * Dp:1 * Dp].reshape(TB, Lp, Dp),
                 qkv_r[:, 1 * Dp:2 * Dp].reshape(TB, Lp, Dp),
                 qkv_r[:, 2 * Dp:3 * Dp].reshape(TB, Lp, Dp),
                 bias=bias)
    att_r = matmul(att_r.reshape(TB * Lp, Dp), 20)
    recon = ff(att_r, 11, 12)       # reference reuses self.ff2 (ff2_recon unused)
    rec_ref[...] = recon.reshape(TB, Lp, Dp)


# --------------------------------- forward ----------------------------------

@functools.partial(jax.jit, static_argnames=("l_recon", "num_batch_tiles"))
def encoder_pooler_forward(params, x, l_recon, num_batch_tiles=1):
    """Mirrors MyEncoderPooler_ae.forward; x: [B, S, D] float32."""
    B, S, D = x.shape
    Dp = _DP
    assert D == 64, "kernel specialized to the single-head (D == 64) config"
    assert B % num_batch_tiles == 0
    TB = B // num_batch_tiles

    q = params["query_p"]           # [C,  Dp] f32
    qr = params["query_recon_p"]    # [Lp, Dp] f32 (row-padded)
    w = params["w_all"]             # [Dp, NBLK*Dp] bf16
    b = params["b_all"]             # [1,  NBLK*Dp] f32
    C, Lp = q.shape[0], qr.shape[0]

    xp = jnp.pad(x, ((0, 0), (0, 0), (0, Dp - D)))   # lane-dense input slab

    def mm(m, k, n):
        return 2 * m * k * n
    flops_elem = (mm(S, Dp, 5 * Dp) + 2 * mm(S, S, Dp) + mm(S, Dp, Dp)
                  + 2 * mm(C, S, Dp) + 2 * mm(C, Dp, Dp)
                  + mm(C, Dp, 3 * Dp) + 2 * mm(C, C, Dp) + mm(C, Dp, Dp)
                  + 2 * mm(C, Dp, Dp) + mm(C, Dp, 2 * Dp)
                  + 2 * mm(Lp, C, Dp) + 2 * mm(Lp, Dp, Dp)
                  + mm(Lp, Dp, 3 * Dp) + 2 * mm(Lp, Lp, Dp) + mm(Lp, Dp, Dp)
                  + 2 * mm(Lp, Dp, Dp))
    cost = pl.CostEstimate(
        flops=B * flops_elem,
        transcendentals=B * (4 * (C + Lp) * Dp
                             + C * S + S * S + C * C + Lp * C + Lp * Lp),
        bytes_accessed=(xp.size * 4 + w.size * 2 + b.size * 4 + q.size * 4
                        + qr.size * 4 + B * S * Dp * 4 + B * Lp * Dp * 4))

    cx, rec = pl.pallas_call(
        functools.partial(_fused_kernel, d_real=D, l_real=l_recon),
        grid=(num_batch_tiles,),
        in_specs=[
            pl.BlockSpec((TB, S, Dp), lambda i: (i, 0, 0)),
            pl.BlockSpec(q.shape, lambda i: (0, 0)),
            pl.BlockSpec(qr.shape, lambda i: (0, 0)),
            pl.BlockSpec(w.shape, lambda i: (0, 0)),
            pl.BlockSpec(b.shape, lambda i: (0, 0)),
        ],
        out_specs=(pl.BlockSpec((TB, S, Dp), lambda i: (i, 0, 0)),
                   pl.BlockSpec((TB, Lp, Dp), lambda i: (i, 0, 0))),
        out_shape=(jax.ShapeDtypeStruct((B, S, Dp), jnp.float32),
                   jax.ShapeDtypeStruct((B, Lp, Dp), jnp.float32)),
        compiler_params=pltpu.CompilerParams(
            dimension_semantics=("parallel",)),
        cost_estimate=cost,
    )(xp, q, qr, w, b)

    concepts = cx[..., :D]                 # drop lane padding (XLA-side slice)
    recon = rec[:, :l_recon, :D]           # drop row + lane padding
    # reference returns (concepts, reconstruted, input, concepts)
    return concepts, recon, x, concepts


# ------------------------------ parameters -----------------------------------

def init_raw_params(key, D=64, max_len=8, num_concepts=8):
    """Torch-layout parameters (weights [out, in], biases [out])."""
    keys = iter(jax.random.split(key, 64))

    def p(shape, scale=0.1):
        return (scale * jax.random.normal(next(keys), shape)).astype(jnp.float32)

    return dict(
        query=p((num_concepts, D), 1.0),
        pk_w=p((D, D)), pk_b=p((D,)),
        pv_w=p((D, D)), pv_b=p((D,)),
        ff_w1=p((D, D)), ff_b1=p((D,)), ff_w2=p((D, D)), ff_b2=p((D,)),
        ff2_w1=p((D, D)), ff2_b1=p((D,)), ff2_w2=p((D, D)), ff2_b2=p((D,)),
        att_in_w=p((3 * D, D)), att_in_b=p((3 * D,)),
        att_out_w=p((D, D)), att_out_b=p((D,)),
        query_recon=p((max_len - 1, D), 1.0),
        pkr_w=p((D, D)), pkr_b=p((D,)),
        pvr_w=p((D, D)), pvr_b=p((D,)),
        ffr_w1=p((D, D)), ffr_b1=p((D,)), ffr_w2=p((D, D)), ffr_b2=p((D,)),
        attr_in_w=p((3 * D, D)), attr_in_b=p((3 * D,)),
        attr_out_w=p((D, D)), attr_out_b=p((D,)),
        # ff2_recon: declared in the reference __init__ but never used in forward.
    )


def prepare_params(raw, dp=_DP):
    """One-time conversion: transpose to [in,out], zero-pad every group to 128
    lanes, and pack all weights/biases into one [128, 21*128] bf16 matrix and
    one [1, 21*128] f32 bias row so the kernel sees 5 operands total."""
    f32 = jnp.float32
    D = raw["pk_w"].shape[0]

    def wpad(w):                               # torch [out,in] -> padded [dp,dp]
        w = jnp.asarray(w, f32).T
        return jnp.pad(w, ((0, dp - w.shape[0]), (0, dp - w.shape[1])))

    def bpad(b):
        b = jnp.asarray(b, f32)
        return jnp.pad(b, (0, dp - b.shape[0])).reshape(1, dp)

    aq, ak, av = raw["att_in_w"][:D], raw["att_in_w"][D:2 * D], raw["att_in_w"][2 * D:]
    abq, abk, abv = raw["att_in_b"][:D], raw["att_in_b"][D:2 * D], raw["att_in_b"][2 * D:]
    rq, rk, rv = raw["attr_in_w"][:D], raw["attr_in_w"][D:2 * D], raw["attr_in_w"][2 * D:]
    rbq, rbk, rbv = raw["attr_in_b"][:D], raw["attr_in_b"][D:2 * D], raw["attr_in_b"][2 * D:]

    w_blocks = [raw["pk_w"], raw["pv_w"], aq, ak, av,        # 0-4  fused x projection
                raw["ff_w1"], raw["ff_w2"],                  # 5-6
                aq, ak, av,                                  # 7-9  att in_proj
                raw["att_out_w"],                            # 10
                raw["ff2_w1"], raw["ff2_w2"],                # 11-12
                raw["pkr_w"], raw["pvr_w"],                  # 13-14
                raw["ffr_w1"], raw["ffr_w2"],                # 15-16
                rq, rk, rv,                                  # 17-19 att_recon in_proj
                raw["attr_out_w"]]                           # 20
    b_blocks = [raw["pk_b"], raw["pv_b"], abq, abk, abv,
                raw["ff_b1"], raw["ff_b2"],
                abq, abk, abv,
                raw["att_out_b"],
                raw["ff2_b1"], raw["ff2_b2"],
                raw["pkr_b"], raw["pvr_b"],
                raw["ffr_b1"], raw["ffr_b2"],
                rbq, rbk, rbv,
                raw["attr_out_b"]]
    assert len(w_blocks) == _NBLK and len(b_blocks) == _NBLK

    w_all = jnp.concatenate([wpad(w) for w in w_blocks], axis=1).astype(jnp.bfloat16)
    b_all = jnp.concatenate([bpad(b) for b in b_blocks], axis=1)

    q = jnp.asarray(raw["query"], f32)
    query_p = jnp.pad(q, ((0, 0), (0, dp - q.shape[1])))
    qr = jnp.asarray(raw["query_recon"], f32)
    lp = int(pl.cdiv(qr.shape[0], 8) * 8)           # pad recon rows to sublane tile
    query_recon_p = jnp.pad(qr, ((0, lp - qr.shape[0]), (0, dp - qr.shape[1])))
    return dict(query_p=query_p, query_recon_p=query_recon_p,
                w_all=w_all, b_all=b_all)


# --------------------------- pure-JAX reference ------------------------------

def reference_forward(raw, x):
    """Plain-jnp mirror of the PyTorch forward (float32, exact GELU)."""
    B = x.shape[0]
    gelu = lambda z: jax.nn.gelu(z, approximate=False)
    lin = lambda z, w, bb: z @ w.T + bb

    def sdpa(q, k, v):
        s = jnp.einsum('...qd,...kd->...qk', q, k) / math.sqrt(q.shape[-1])
        return jnp.einsum('...qk,...kd->...qd', jax.nn.softmax(s, axis=-1), v)

    def ffseq(z, w1, b1, w2, b2):
        return lin(gelu(lin(z, w1, b1)), w2, b2)

    def mha(xq, in_w, in_b, out_w, out_b):
        qkv = lin(xq, in_w, in_b)
        q, k, v = jnp.split(qkv, 3, axis=-1)
        return lin(sdpa(q, k, v), out_w, out_b)       # single head: head_dim == D

    k = lin(x, raw["pk_w"], raw["pk_b"])
    v = lin(x, raw["pv_w"], raw["pv_b"])
    q0 = jnp.broadcast_to(raw["query"][None], (B,) + raw["query"].shape)
    att = sdpa(q0, k, v)
    att = ffseq(att, raw["ff_w1"], raw["ff_b1"], raw["ff_w2"], raw["ff_b2"])
    att = mha(att, raw["att_in_w"], raw["att_in_b"], raw["att_out_w"], raw["att_out_b"])
    concepts = ffseq(att, raw["ff2_w1"], raw["ff2_b1"], raw["ff2_w2"], raw["ff2_b2"])

    k_r = lin(concepts, raw["pkr_w"], raw["pkr_b"])
    v_r = lin(concepts, raw["pvr_w"], raw["pvr_b"])
    qr = jnp.broadcast_to(raw["query_recon"][None], (B,) + raw["query_recon"].shape)
    att_r = sdpa(qr, k_r, v_r)
    att_r = ffseq(att_r, raw["ffr_w1"], raw["ffr_b1"], raw["ffr_w2"], raw["ffr_b2"])
    att_r = mha(att_r, raw["attr_in_w"], raw["attr_in_b"],
                raw["attr_out_w"], raw["attr_out_b"])
    recon = ffseq(att_r, raw["ff2_w1"], raw["ff2_b1"], raw["ff2_w2"], raw["ff2_b2"])

    concepts_out = mha(x, raw["att_in_w"], raw["att_in_b"],
                       raw["att_out_w"], raw["att_out_b"])
    return concepts_out, recon, x, concepts_out


# ---------------------------------- main -------------------------------------

if __name__ == "__main__":
    B, S = 2, 8
    D = 64               # input_dim == output_dim (required by the reference forward)
    MAX_LEN = 8
    NUM_CONCEPTS = 8

    key = jax.random.PRNGKey(0)
    pkey, xkey = jax.random.split(key)
    raw = init_raw_params(pkey, D=D, max_len=MAX_LEN, num_concepts=NUM_CONCEPTS)
    params = prepare_params(raw)
    x = jax.random.normal(xkey, (B, S, D), dtype=jnp.float32)

    # num_batch_tiles=1: whole batch per grid step (single-TC chips).  On v7x
    # with larger batches, num_batch_tiles=2 splits work across both TensorCores.
    outs = encoder_pooler_forward(params, x, l_recon=MAX_LEN - 1, num_batch_tiles=1)
    outs = jax.block_until_ready(outs)

    assert outs[0].shape == (B, S, D)
    assert outs[1].shape == (B, MAX_LEN - 1, D)
    assert outs[2].shape == (B, S, D)
    assert outs[3].shape == (B, S, D)
    assert all(bool(jnp.all(jnp.isfinite(o))) for o in outs)

    # numeric check vs. pure-JAX float32 reference; tolerance covers bf16 matmul
    # operands, tanh-GELU and the approximate softmax reciprocal.
    ref = reference_forward(raw, x)
    for o, r in zip(outs[:2], ref[:2]):
        assert bool(jnp.allclose(o, r, atol=5e-2, rtol=5e-2)), \
            float(jnp.max(jnp.abs(o - r)))

    print("KERNEL_OK")
</pallas_src>

<mosaic_0001>
module attributes {stable_mosaic.version = 11 : i64} {
  func.func @_fused_kernel(%arg0: i32, %arg1: memref<2x8x128xf32, #tpu.memory_space<vmem>>, %arg2: memref<8x128xf32, #tpu.memory_space<vmem>>, %arg3: memref<8x128xf32, #tpu.memory_space<vmem>>, %arg4: memref<128x2688xbf16, #tpu.memory_space<vmem>>, %arg5: memref<1x2688xf32, #tpu.memory_space<vmem>>, %arg6: memref<2x8x128xf32, #tpu.memory_space<vmem>>, %arg7: memref<2x8x128xf32, #tpu.memory_space<vmem>>) attributes {dimension_semantics = [#tpu.dimension_semantics<parallel>], iteration_bounds = array<i64: 1>, scalar_prefetch = 0 : i64, scratch_operands = 0 : i64, tpu.core_type = #tpu.core_type<tc>, window_params = [{transform_indices = @transform_0, window_bounds = array<i64: 2, 8, 128>}, {pipeline_mode = #tpu.pipeline_mode<synchronous>, transform_indices = @transform_1, window_bounds = array<i64: 8, 128>}, {pipeline_mode = #tpu.pipeline_mode<synchronous>, transform_indices = @transform_2, window_bounds = array<i64: 8, 128>}, {pipeline_mode = #tpu.pipeline_mode<synchronous>, transform_indices = @transform_3, window_bounds = array<i64: 128, 2688>}, {pipeline_mode = #tpu.pipeline_mode<synchronous>, transform_indices = @transform_4, window_bounds = array<i64: 1, 2688>}, {transform_indices = @transform_5, window_bounds = array<i64: 2, 8, 128>}, {transform_indices = @transform_6, window_bounds = array<i64: 2, 8, 128>}]} {
    %c0 = arith.constant 0 : index
    %c0_0 = arith.constant 0 : index
    %c0_1 = arith.constant 0 : index
    %0 = vector.load %arg1[%c0, %c0_0, %c0_1] : memref<2x8x128xf32, #tpu.memory_space<vmem>>, vector<2x8x128xf32>
    %1 = vector.shape_cast %0 : vector<2x8x128xf32> to vector<16x128xf32>
    %2 = arith.truncf %1 : vector<16x128xf32> to vector<16x128xbf16>
    %c0_2 = arith.constant 0 : index
    %c0_3 = arith.constant 0 : index
    %3 = vector.load %arg4[%c0_2, %c0_3] : memref<128x2688xbf16, #tpu.memory_space<vmem>>, vector<128x640xbf16>
    %cst = arith.constant dense<0.000000e+00> : vector<16x640xf32>
    %4 = tpu.matmul %2, %3, %cst {dimension_numbers = #tpu.dot_dimension_numbers<[1], [0], [0], [1], [0, 0, 1, 1], [], []>} : vector<16x128xbf16>, vector<128x640xbf16>, vector<16x640xf32> -> vector<16x640xf32>
    %c0_4 = arith.constant 0 : index
    %c0_5 = arith.constant 0 : index
    %5 = vector.load %arg5[%c0_4, %c0_5] : memref<1x2688xf32, #tpu.memory_space<vmem>>, vector<1x640xf32>
    %6 = vector.broadcast %5 : vector<1x640xf32> to vector<16x640xf32>
    %7 = arith.addf %4, %6 : vector<16x640xf32>
    %8 = vector.extract_strided_slice %7 {offsets = [0, 0], sizes = [16, 128], strides = [1, 1]} : vector<16x640xf32> to vector<16x128xf32>
    %9 = vector.shape_cast %8 : vector<16x128xf32> to vector<2x8x128xf32>
    %10 = vector.extract_strided_slice %7 {offsets = [0, 128], sizes = [16, 128], strides = [1, 1]} : vector<16x640xf32> to vector<16x128xf32>
    %11 = vector.shape_cast %10 : vector<16x128xf32> to vector<2x8x128xf32>
    %12 = vector.extract_strided_slice %7 {offsets = [0, 256], sizes = [16, 128], strides = [1, 1]} : vector<16x640xf32> to vector<16x128xf32>
    %13 = vector.shape_cast %12 : vector<16x128xf32> to vector<2x8x128xf32>
    %14 = vector.extract_strided_slice %7 {offsets = [0, 384], sizes = [16, 128], strides = [1, 1]} : vector<16x640xf32> to vector<16x128xf32>
    %15 = vector.shape_cast %14 : vector<16x128xf32> to vector<2x8x128xf32>
    %16 = vector.extract_strided_slice %7 {offsets = [0, 512], sizes = [16, 128], strides = [1, 1]} : vector<16x640xf32> to vector<16x128xf32>
    %17 = vector.shape_cast %16 : vector<16x128xf32> to vector<2x8x128xf32>
    %18 = arith.truncf %13 : vector<2x8x128xf32> to vector<2x8x128xbf16>
    %19 = arith.truncf %15 : vector<2x8x128xf32> to vector<2x8x128xbf16>
    "tpu.trace_start"() <{level = 10 : i32, message = "bqd,bkd->bqk"}> : () -> ()
    %cst_6 = arith.constant dense<0.000000e+00> : vector<2x8x8xf32>
    %20 = tpu.matmul %18, %19, %cst_6 {dimension_numbers = #tpu.dot_dimension_numbers<[2], [2], [1], [1], [0, 0, 0, 1, 1, 1], [0], [0]>} : vector<2x8x128xbf16>, vector<2x8x128xbf16>, vector<2x8x8xf32> -> vector<2x8x8xf32>
    "tpu.trace_stop"() : () -> ()
    %cst_7 = arith.constant 1.250000e-01 : f32
    %21 = vector.broadcast %cst_7 : f32 to vector<2x8x8xf32>
    %22 = arith.mulf %20, %21 : vector<2x8x8xf32>
    %cst_8 = arith.constant dense<0xFF800000> : vector<2x8xf32>
    %23 = vector.multi_reduction <maximumf>, %22, %cst_8 [2] : vector<2x8x8xf32> to vector<2x8xf32>
    %24 = vector.shape_cast %23 : vector<2x8xf32> to vector<2x8x1xf32>
    %25 = vector.broadcast %24 : vector<2x8x1xf32> to vector<2x8x8xf32>
    %26 = arith.subf %22, %25 : vector<2x8x8xf32>
    %27 = math.exp %26 : vector<2x8x8xf32>
    %cst_9 = arith.constant dense<0.000000e+00> : vector<2x8xf32>
    %28 = vector.multi_reduction <add>, %27, %cst_9 [2] : vector<2x8x8xf32> to vector<2x8xf32>
    %29 = vector.shape_cast %28 : vector<2x8xf32> to vector<2x8x1xf32>
    %30 = tpu.reciprocal %29 {approx = true} : vector<2x8x1xf32> -> vector<2x8x1xf32>
    %31 = vector.broadcast %30 : vector<2x8x1xf32> to vector<2x8x8xf32>
    %32 = arith.mulf %27, %31 : vector<2x8x8xf32>
    %33 = arith.truncf %32 : vector<2x8x8xf32> to vector<2x8x8xbf16>
    %34 = arith.truncf %17 : vector<2x8x128xf32> to vector<2x8x128xbf16>
    "tpu.trace_start"() <{level = 10 : i32, message = "bqk,bkd->bqd"}> : () -> ()
    %cst_10 = arith.constant dense<0.000000e+00> : vector<2x8x128xf32>
    %35 = tpu.matmul %33, %34, %cst_10 {dimension_numbers = #tpu.dot_dimension_numbers<[2], [1], [1], [2], [0, 0, 0, 1, 1, 2], [0], [0]>} : vector<2x8x8xbf16>, vector<2x8x128xbf16>, vector<2x8x128xf32> -> vector<2x8x128xf32>
    "tpu.trace_stop"() : () -> ()
    %36 = vector.shape_cast %35 : vector<2x8x128xf32> to vector<16x128xf32>
    %37 = arith.truncf %36 : vector<16x128xf32> to vector<16x128xbf16>
    %c0_11 = arith.constant 0 : index
    %c1280 = arith.constant 1280 : index
    %38 = vector.load %arg4[%c0_11, %c1280] : memref<128x2688xbf16, #tpu.memory_space<vmem>>, vector<128x128xbf16>
    %cst_12 = arith.constant dense<0.000000e+00> : vector<16x128xf32>
    %39 = tpu.matmul %37, %38, %cst_12 {dimension_numbers = #tpu.dot_dimension_numbers<[1], [0], [0], [1], [0, 0, 1, 1], [], []>} : vector<16x128xbf16>, vector<128x128xbf16>, vector<16x128xf32> -> vector<16x128xf32>
    %c0_13 = arith.constant 0 : index
    %c1280_14 = arith.constant 1280 : index
    %40 = vector.load %arg5[%c0_13, %c1280_14] : memref<1x2688xf32, #tpu.memory_space<vmem>>, vector<1x128xf32>
    %41 = vector.broadcast %40 : vector<1x128xf32> to vector<16x128xf32>
    %42 = arith.addf %39, %41 : vector<16x128xf32>
    %43 = vector.shape_cast %42 : vector<16x128xf32> to vector<2x8x128xf32>
    %c0_15 = arith.constant 0 : index
    %c0_16 = arith.constant 0 : index
    %c0_17 = arith.constant 0 : index
    %44 = vector.load %arg6[%c0_15, %c0_16, %c0_17] : memref<2x8x128xf32, #tpu.memory_space<vmem>>, vector<2x8x128xf32>
    tpu.vector_store %arg6[%c0_15, %c0_16, %c0_17], %43 {strides = array<i32>} : memref<2x8x128xf32, #tpu.memory_space<vmem>>, vector<2x8x128xf32>,
    %c0_18 = arith.constant 0 : index
    %c0_19 = arith.constant 0 : index
    %45 = vector.load %arg2[%c0_18, %c0_19] : memref<8x128xf32, #tpu.memory_space<vmem>>, vector<8x128xf32>
    %46 = vector.shape_cast %45 : vector<8x128xf32> to vector<1x8x128xf32>
    %47 = vector.shape_cast %46 : vector<1x8x128xf32> to vector<1x8x128xf32>
    %48 = vector.broadcast %47 : vector<1x8x128xf32> to vector<2x8x128xf32>
    %49 = arith.truncf %48 : vector<2x8x128xf32> to vector<2x8x128xbf16>
    %50 = arith.truncf %9 : vector<2x8x128xf32> to vector<2x8x128xbf16>
    "tpu.trace_start"() <{level = 10 : i32, message = "bqd,bkd->bqk"}> : () -> ()
    %cst_20 = arith.constant dense<0.000000e+00> : vector<2x8x8xf32>
    %51 = tpu.matmul %49, %50, %cst_20 {dimension_numbers = #tpu.dot_dimension_numbers<[2], [2], [1], [1], [0, 0, 0, 1, 1, 1], [0], [0]>} : vector<2x8x128xbf16>, vector<2x8x128xbf16>, vector<2x8x8xf32> -> vector<2x8x8xf32>
    "tpu.trace_stop"() : () -> ()
    %cst_21 = arith.constant 1.250000e-01 : f32
    %52 = vector.broadcast %cst_21 : f32 to vector<2x8x8xf32>
    %53 = arith.mulf %51, %52 : vector<2x8x8xf32>
    %cst_22 = arith.constant dense<0xFF800000> : vector<2x8xf32>
    %54 = vector.multi_reduction <maximumf>, %53, %cst_22 [2] : vector<2x8x8xf32> to vector<2x8xf32>
    %55 = vector.shape_cast %54 : vector<2x8xf32> to vector<2x8x1xf32>
    %56 = vector.broadcast %55 : vector<2x8x1xf32> to vector<2x8x8xf32>
    %57 = arith.subf %53, %56 : vector<2x8x8xf32>
    %58 = math.exp %57 : vector<2x8x8xf32>
    %cst_23 = arith.constant dense<0.000000e+00> : vector<2x8xf32>
    %59 = vector.multi_reduction <add>, %58, %cst_23 [2] : vector<2x8x8xf32> to vector<2x8xf32>
    %60 = vector.shape_cast %59 : vector<2x8xf32> to vector<2x8x1xf32>
    %61 = tpu.reciprocal %60 {approx = true} : vector<2x8x1xf32> -> vector<2x8x1xf32>
    %62 = vector.broadcast %61 : vector<2x8x1xf32> to vector<2x8x8xf32>
    %63 = arith.mulf %58, %62 : vector<2x8x8xf32>
    %64 = arith.truncf %63 : vector<2x8x8xf32> to vector<2x8x8xbf16>
    %65 = arith.truncf %11 : vector<2x8x128xf32> to vector<2x8x128xbf16>
    "tpu.trace_start"() <{level = 10 : i32, message = "bqk,bkd->bqd"}> : () -> ()
    %cst_24 = arith.constant dense<0.000000e+00> : vector<2x8x128xf32>
    %66 = tpu.matmul %64, %65, %cst_24 {dimension_numbers = #tpu.dot_dimension_numbers<[2], [1], [1], [2], [0, 0, 0, 1, 1, 2], [0], [0]>} : vector<2x8x8xbf16>, vector<2x8x128xbf16>, vector<2x8x128xf32> -> vector<2x8x128xf32>
    "tpu.trace_stop"() : () -> ()
    %67 = vector.shape_cast %66 : vector<2x8x128xf32> to vector<16x128xf32>
    %68 = arith.truncf %67 : vector<16x128xf32> to vector<16x128xbf16>
    %c0_25 = arith.constant 0 : index
    %c640 = arith.constant 640 : index
    %69 = vector.load %arg4[%c0_25, %c640] : memref<128x2688xbf16, #tpu.memory_space<vmem>>, vector<128x128xbf16>
    %cst_26 = arith.constant dense<0.000000e+00> : vector<16x128xf32>
    %70 = tpu.matmul %68, %69, %cst_26 {dimension_numbers = #tpu.dot_dimension_numbers<[1], [0], [0], [1], [0, 0, 1, 1], [], []>} : vector<16x128xbf16>, vector<128x128xbf16>, vector<16x128xf32> -> vector<16x128xf32>
    %c0_27 = arith.constant 0 : index
    %c640_28 = arith.constant 640 : index
    %71 = vector.load %arg5[%c0_27, %c640_28] : memref<1x2688xf32, #tpu.memory_space<vmem>>, vector<1x128xf32>
    %72 = vector.broadcast %71 : vector<1x128xf32> to vector<16x128xf32>
    %73 = arith.addf %70, %72 : vector<16x128xf32>
    %cst_29 = arith.constant 5.000000e-01 : f32
    %74 = vector.broadcast %cst_29 : f32 to vector<16x128xf32>
    %75 = arith.mulf %74, %73 : vector<16x128xf32>
    %76 = arith.mulf %73, %73 : vector<16x128xf32>
    %77 = arith.mulf %76, %73 : vector<16x128xf32>
    %cst_30 = arith.constant 4.471500e-02 : f32
    %78 = vector.broadcast %cst_30 : f32 to vector<16x128xf32>
    %79 = arith.mulf %78, %77 : vector<16x128xf32>
    %80 = arith.addf %73, %79 : vector<16x128xf32>
    %cst_31 = arith.constant 0.797884583 : f32
    %81 = vector.broadcast %cst_31 : f32 to vector<16x128xf32>
    %82 = arith.mulf %81, %80 : vector<16x128xf32>
    %83 = math.tanh %82 : vector<16x128xf32>
    %cst_32 = arith.constant 1.000000e+00 : f32
    %84 = vector.broadcast %cst_32 : f32 to vector<16x128xf32>
    %85 = arith.addf %84, %83 : vector<16x128xf32>
    %86 = arith.mulf %75, %85 : vector<16x128xf32>
    %87 = arith.truncf %86 : vector<16x128xf32> to vector<16x128xbf16>
    %c0_33 = arith.constant 0 : index
    %c768 = arith.constant 768 : index
    %88 = vector.load %arg4[%c0_33, %c768] : memref<128x2688xbf16, #tpu.memory_space<vmem>>, vector<128x128xbf16>
    %cst_34 = arith.constant dense<0.000000e+00> : vector<16x128xf32>
    %89 = tpu.matmul %87, %88, %cst_34 {dimension_numbers = #tpu.dot_dimension_numbers<[1], [0], [0], [1], [0, 0, 1, 1], [], []>} : vector<16x128xbf16>, vector<128x128xbf16>, vector<16x128xf32> -> vector<16x128xf32>
    %c0_35 = arith.constant 0 : index
    %c768_36 = arith.constant 768 : index
    %90 = vector.load %arg5[%c0_35, %c768_36] : memref<1x2688xf32, #tpu.memory_space<vmem>>, vector<1x128xf32>
    %91 = vector.broadcast %90 : vector<1x128xf32> to vector<16x128xf32>
    %92 = arith.addf %89, %91 : vector<16x128xf32>
    %93 = arith.truncf %92 : vector<16x128xf32> to vector<16x128xbf16>
    %c0_37 = arith.constant 0 : index
    %c896 = arith.constant 896 : index
    %94 = vector.load %arg4[%c0_37, %c896] : memref<128x2688xbf16, #tpu.memory_space<vmem>>, vector<128x384xbf16>
    %cst_38 = arith.constant dense<0.000000e+00> : vector<16x384xf32>
    %95 = tpu.matmul %93, %94, %cst_38 {dimension_numbers = #tpu.dot_dimension_numbers<[1], [0], [0], [1], [0, 0, 1, 1], [], []>} : vector<16x128xbf16>, vector<128x384xbf16>, vector<16x384xf32> -> vector<16x384xf32>
    %c0_39 = arith.constant 0 : index
    %c896_40 = arith.constant 896 : index
    %96 = vector.load %arg5[%c0_39, %c896_40] : memref<1x2688xf32, #tpu.memory_space<vmem>>, vector<1x384xf32>
    %97 = vector.broadcast %96 : vector<1x384xf32> to vector<16x384xf32>
    %98 = arith.addf %95, %97 : vector<16x384xf32>
    %99 = vector.extract_strided_slice %98 {offsets = [0, 0], sizes = [16, 128], strides = [1, 1]} : vector<16x384xf32> to vector<16x128xf32>
    %100 = vector.shape_cast %99 : vector<16x128xf32> to vector<2x8x128xf32>
    %101 = vector.extract_strided_slice %98 {offsets = [0, 128], sizes = [16, 128], strides = [1, 1]} : vector<16x384xf32> to vector<16x128xf32>
    %102 = vector.shape_cast %101 : vector<16x128xf32> to vector<2x8x128xf32>
    %103 = vector.extract_strided_slice %98 {offsets = [0, 256], sizes = [16, 128], strides = [1, 1]} : vector<16x384xf32> to vector<16x128xf32>
    %104 = vector.shape_cast %103 : vector<16x128xf32> to vector<2x8x128xf32>
    %105 = arith.truncf %100 : vector<2x8x128xf32> to vector<2x8x128xbf16>
    %106 = arith.truncf %102 : vector<2x8x128xf32> to vector<2x8x128xbf16>
    "tpu.trace_start"() <{level = 10 : i32, message = "bqd,bkd->bqk"}> : () -> ()
    %cst_41 = arith.constant dense<0.000000e+00> : vector<2x8x8xf32>
    %107 = tpu.matmul %105, %106, %cst_41 {dimension_numbers = #tpu.dot_dimension_numbers<[2], [2], [1], [1], [0, 0, 0, 1, 1, 1], [0], [0]>} : vector<2x8x128xbf16>, vector<2x8x128xbf16>, vector<2x8x8xf32> -> vector<2x8x8xf32>
    "tpu.trace_stop"() : () -> ()
    %cst_42 = arith.constant 1.250000e-01 : f32
    %108 = vector.broadcast %cst_42 : f32 to vector<2x8x8xf32>
    %109 = arith.mulf %107, %108 : vector<2x8x8xf32>
    %cst_43 = arith.constant dense<0xFF800000> : vector<2x8xf32>
    %110 = vector.multi_reduction <maximumf>, %109, %cst_43 [2] : vector<2x8x8xf32> to vector<2x8xf32>
    %111 = vector.shape_cast %110 : vector<2x8xf32> to vector<2x8x1xf32>
    %112 = vector.broadcast %111 : vector<2x8x1xf32> to vector<2x8x8xf32>
    %113 = arith.subf %109, %112 : vector<2x8x8xf32>
    %114 = math.exp %113 : vector<2x8x8xf32>
    %cst_44 = arith.constant dense<0.000000e+00> : vector<2x8xf32>
    %115 = vector.multi_reduction <add>, %114, %cst_44 [2] : vector<2x8x8xf32> to vector<2x8xf32>
    %116 = vector.shape_cast %115 : vector<2x8xf32> to vector<2x8x1xf32>
    %117 = tpu.reciprocal %116 {approx = true} : vector<2x8x1xf32> -> vector<2x8x1xf32>
    %118 = vector.broadcast %117 : vector<2x8x1xf32> to vector<2x8x8xf32>
    %119 = arith.mulf %114, %118 : vector<2x8x8xf32>
    %120 = arith.truncf %119 : vector<2x8x8xf32> to vector<2x8x8xbf16>
    %121 = arith.truncf %104 : vector<2x8x128xf32> to vector<2x8x128xbf16>
    "tpu.trace_start"() <{level = 10 : i32, message = "bqk,bkd->bqd"}> : () -> ()
    %cst_45 = arith.constant dense<0.000000e+00> : vector<2x8x128xf32>
    %122 = tpu.matmul %120, %121, %cst_45 {dimension_numbers = #tpu.dot_dimension_numbers<[2], [1], [1], [2], [0, 0, 0, 1, 1, 2], [0], [0]>} : vector<2x8x8xbf16>, vector<2x8x128xbf16>, vector<2x8x128xf32> -> vector<2x8x128xf32>
    "tpu.trace_stop"() : () -> ()
    %123 = vector.shape_cast %122 : vector<2x8x128xf32> to vector<16x128xf32>
    %124 = arith.truncf %123 : vector<16x128xf32> to vector<16x128xbf16>
    %c0_46 = arith.constant 0 : index
    %c1280_47 = arith.constant 1280 : index
    %125 = vector.load %arg4[%c0_46, %c1280_47] : memref<128x2688xbf16, #tpu.memory_space<vmem>>, vector<128x128xbf16>
    %cst_48 = arith.constant dense<0.000000e+00> : vector<16x128xf32>
    %126 = tpu.matmul %124, %125, %cst_48 {dimension_numbers = #tpu.dot_dimension_numbers<[1], [0], [0], [1], [0, 0, 1, 1], [], []>} : vector<16x128xbf16>, vector<128x128xbf16>, vector<16x128xf32> -> vector<16x128xf32>
    %c0_49 = arith.constant 0 : index
    %c1280_50 = arith.constant 1280 : index
    %127 = vector.load %arg5[%c0_49, %c1280_50] : memref<1x2688xf32, #tpu.memory_space<vmem>>, vector<1x128xf32>
    %128 = vector.broadcast %127 : vector<1x128xf32> to vector<16x128xf32>
    %129 = arith.addf %126, %128 : vector<16x128xf32>
    %130 = arith.truncf %129 : vector<16x128xf32> to vector<16x128xbf16>
    %c0_51 = arith.constant 0 : index
    %c1408 = arith.constant 1408 : index
    %131 = vector.load %arg4[%c0_51, %c1408] : memref<128x2688xbf16, #tpu.memory_space<vmem>>, vector<128x128xbf16>
    %cst_52 = arith.constant dense<0.000000e+00> : vector<16x128xf32>
    %132 = tpu.matmul %130, %131, %cst_52 {dimension_numbers = #tpu.dot_dimension_numbers<[1], [0], [0], [1], [0, 0, 1, 1], [], []>} : vector<16x128xbf16>, vector<128x128xbf16>, vector<16x128xf32> -> vector<16x128xf32>
    %c0_53 = arith.constant 0 : index
    %c1408_54 = arith.constant 1408 : index
    %133 = vector.load %arg5[%c0_53, %c1408_54] : memref<1x2688xf32, #tpu.memory_space<vmem>>, vector<1x128xf32>
    %134 = vector.broadcast %133 : vector<1x128xf32> to vector<16x128xf32>
    %135 = arith.addf %132, %134 : vector<16x128xf32>
    %cst_55 = arith.constant 5.000000e-01 : f32
    %136 = vector.broadcast %cst_55 : f32 to vector<16x128xf32>
    %137 = arith.mulf %136, %135 : vector<16x128xf32>
    %138 = arith.mulf %135, %135 : vector<16x128xf32>
    %139 = arith.mulf %138, %135 : vector<16x128xf32>
    %cst_56 = arith.constant 4.471500e-02 : f32
    %140 = vector.broadcast %cst_56 : f32 to vector<16x128xf32>
    %141 = arith.mulf %140, %139 : vector<16x128xf32>
    %142 = arith.addf %135, %141 : vector<16x128xf32>
    %cst_57 = arith.constant 0.797884583 : f32
    %143 = vector.broadcast %cst_57 : f32 to vector<16x128xf32>
    %144 = arith.mulf %143, %142 : vector<16x128xf32>
    %145 = math.tanh %144 : vector<16x128xf32>
    %cst_58 = arith.constant 1.000000e+00 : f32
    %146 = vector.broadcast %cst_58 : f32 to vector<16x128xf32>
    %147 = arith.addf %146, %145 : vector<16x128xf32>
    %148 = arith.mulf %137, %147 : vector<16x128xf32>
    %149 = arith.truncf %148 : vector<16x128xf32> to vector<16x128xbf16>
    %c0_59 = arith.constant 0 : index
    %c1536 = arith.constant 1536 : index
    %150 = vector.load %arg4[%c0_59, %c1536] : memref<128x2688xbf16, #tpu.memory_space<vmem>>, vector<128x128xbf16>
    %cst_60 = arith.constant dense<0.000000e+00> : vector<16x128xf32>
    %151 = tpu.matmul %149, %150, %cst_60 {dimension_numbers = #tpu.dot_dimension_numbers<[1], [0], [0], [1], [0, 0, 1, 1], [], []>} : vector<16x128xbf16>, vector<128x128xbf16>, vector<16x128xf32> -> vector<16x128xf32>
    %c0_61 = arith.constant 0 : index
    %c1536_62 = arith.constant 1536 : index
    %152 = vector.load %arg5[%c0_61, %c1536_62] : memref<1x2688xf32, #tpu.memory_space<vmem>>, vector<1x128xf32>
    %153 = vector.broadcast %152 : vector<1x128xf32> to vector<16x128xf32>
    %154 = arith.addf %151, %153 : vector<16x128xf32>
    %155 = arith.truncf %154 : vector<16x128xf32> to vector<16x128xbf16>
    %c0_63 = arith.constant 0 : index
    %c1664 = arith.constant 1664 : index
    %156 = vector.load %arg4[%c0_63, %c1664] : memref<128x2688xbf16, #tpu.memory_space<vmem>>, vector<128x256xbf16>
    %cst_64 = arith.constant dense<0.000000e+00> : vector<16x256xf32>
    %157 = tpu.matmul %155, %156, %cst_64 {dimension_numbers = #tpu.dot_dimension_numbers<[1], [0], [0], [1], [0, 0, 1, 1], [], []>} : vector<16x128xbf16>, vector<128x256xbf16>, vector<16x256xf32> -> vector<16x256xf32>
    %c0_65 = arith.constant 0 : index
    %c1664_66 = arith.constant 1664 : index
    %158 = vector.load %arg5[%c0_65, %c1664_66] : memref<1x2688xf32, #tpu.memory_space<vmem>>, vector<1x256xf32>
    %159 = vector.broadcast %158 : vector<1x256xf32> to vector<16x256xf32>
    %160 = arith.addf %157, %159 : vector<16x256xf32>
    %161 = vector.extract_strided_slice %160 {offsets = [0, 0], sizes = [16, 128], strides = [1, 1]} : vector<16x256xf32> to vector<16x128xf32>
    %162 = vector.shape_cast %161 : vector<16x128xf32> to vector<2x8x128xf32>
    %163 = vector.extract_strided_slice %160 {offsets = [0, 128], sizes = [16, 128], strides = [1, 1]} : vector<16x256xf32> to vector<16x128xf32>
    %164 = vector.shape_cast %163 : vector<16x128xf32> to vector<2x8x128xf32>
    %c0_67 = arith.constant 0 : index
    %c0_68 = arith.constant 0 : index
    %165 = vector.load %arg3[%c0_67, %c0_68] : memref<8x128xf32, #tpu.memory_space<vmem>>, vector<8x128xf32>
    %166 = vector.shape_cast %165 : vector<8x128xf32> to vector<1x8x128xf32>
    %167 = vector.shape_cast %166 : vector<1x8x128xf32> to vector<1x8x128xf32>
    %168 = vector.broadcast %167 : vector<1x8x128xf32> to vector<2x8x128xf32>
    %169 = arith.truncf %168 : vector<2x8x128xf32> to vector<2x8x128xbf16>
    %170 = arith.truncf %162 : vector<2x8x128xf32> to vector<2x8x128xbf16>
    "tpu.trace_start"() <{level = 10 : i32, message = "bqd,bkd->bqk"}> : () -> ()
    %cst_69 = arith.constant dense<0.000000e+00> : vector<2x8x8xf32>
    %171 = tpu.matmul %169, %170, %cst_69 {dimension_numbers = #tpu.dot_dimension_numbers<[2], [2], [1], [1], [0, 0, 0, 1, 1, 1], [0], [0]>} : vector<2x8x128xbf16>, vector<2x8x128xbf16>, vector<2x8x8xf32> -> vector<2x8x8xf32>
    "tpu.trace_stop"() : () -> ()
    %cst_70 = arith.constant 1.250000e-01 : f32
    %172 = vector.broadcast %cst_70 : f32 to vector<2x8x8xf32>
    %173 = arith.mulf %171, %172 : vector<2x8x8xf32>
    %cst_71 = arith.constant dense<0xFF800000> : vector<2x8xf32>
    %174 = vector.multi_reduction <maximumf>, %173, %cst_71 [2] : vector<2x8x8xf32> to vector<2x8xf32>
    %175 = vector.shape_cast %174 : vector<2x8xf32> to vector<2x8x1xf32>
    %176 = vector.broadcast %175 : vector<2x8x1xf32> to vector<2x8x8xf32>
    %177 = arith.subf %173, %176 : vector<2x8x8xf32>
    %178 = math.exp %177 : vector<2x8x8xf32>
    %cst_72 = arith.constant dense<0.000000e+00> : vector<2x8xf32>
    %179 = vector.multi_reduction <add>, %178, %cst_72 [2] : vector<2x8x8xf32> to vector<2x8xf32>
    %180 = vector.shape_cast %179 : vector<2x8xf32> to vector<2x8x1xf32>
    %181 = tpu.reciprocal %180 {approx = true} : vector<2x8x1xf32> -> vector<2x8x1xf32>
    %182 = vector.broadcast %181 : vector<2x8x1xf32> to vector<2x8x8xf32>
    %183 = arith.mulf %178, %182 : vector<2x8x8xf32>
    %184 = arith.truncf %183 : vector<2x8x8xf32> to vector<2x8x8xbf16>
    %185 = arith.truncf %164 : vector<2x8x128xf32> to vector<2x8x128xbf16>
    "tpu.trace_start"() <{level = 10 : i32, message = "bqk,bkd->bqd"}> : () -> ()
    %cst_73 = arith.constant dense<0.000000e+00> : vector<2x8x128xf32>
    %186 = tpu.matmul %184, %185, %cst_73 {dimension_numbers = #tpu.dot_dimension_numbers<[2], [1], [1], [2], [0, 0, 0, 1, 1, 2], [0], [0]>} : vector<2x8x8xbf16>, vector<2x8x128xbf16>, vector<2x8x128xf32> -> vector<2x8x128xf32>
    "tpu.trace_stop"() : () -> ()
    %187 = vector.shape_cast %186 : vector<2x8x128xf32> to vector<16x128xf32>
    %188 = arith.truncf %187 : vector<16x128xf32> to vector<16x128xbf16>
    %c0_74 = arith.constant 0 : index
    %c1920 = arith.constant 1920 : index
    %189 = vector.load %arg4[%c0_74, %c1920] : memref<128x2688xbf16, #tpu.memory_space<vmem>>, vector<128x128xbf16>
    %cst_75 = arith.constant dense<0.000000e+00> : vector<16x128xf32>
    %190 = tpu.matmul %188, %189, %cst_75 {dimension_numbers = #tpu.dot_dimension_numbers<[1], [0], [0], [1], [0, 0, 1, 1], [], []>} : vector<16x128xbf16>, vector<128x128xbf16>, vector<16x128xf32> -> vector<16x128xf32>
    %c0_76 = arith.constant 0 : index
    %c1920_77 = arith.constant 1920 : index
    %191 = vector.load %arg5[%c0_76, %c1920_77] : memref<1x2688xf32, #tpu.memory_space<vmem>>, vector<1x128xf32>
    %192 = vector.broadcast %191 : vector<1x128xf32> to vector<16x128xf32>
    %193 = arith.addf %190, %192 : vector<16x128xf32>
    %cst_78 = arith.constant 5.000000e-01 : f32
    %194 = vector.broadcast %cst_78 : f32 to vector<16x128xf32>
    %195 = arith.mulf %194, %193 : vector<16x128xf32>
    %196 = arith.mulf %193, %193 : vector<16x128xf32>
    %197 = arith.mulf %196, %193 : vector<16x128xf32>
    %cst_79 = arith.constant 4.471500e-02 : f32
    %198 = vector.broadcast %cst_79 : f32 to vector<16x128xf32>
    %199 = arith.mulf %198, %197 : vector<16x128xf32>
    %200 = arith.addf %193, %199 : vector<16x128xf32>
    %cst_80 = arith.constant 0.797884583 : f32
    %201 = vector.broadcast %cst_80 : f32 to vector<16x128xf32>
    %202 = arith.mulf %201, %200 : vector<16x128xf32>
    %203 = math.tanh %202 : vector<16x128xf32>
    %cst_81 = arith.constant 1.000000e+00 : f32
    %204 = vector.broadcast %cst_81 : f32 to vector<16x128xf32>
    %205 = arith.addf %204, %203 : vector<16x128xf32>
    %206 = arith.mulf %195, %205 : vector<16x128xf32>
    %207 = arith.truncf %206 : vector<16x128xf32> to vector<16x128xbf16>
    %c0_82 = arith.constant 0 : index
    %c2048 = arith.constant 2048 : index
    %208 = vector.load %arg4[%c0_82, %c2048] : memref<128x2688xbf16, #tpu.memory_space<vmem>>, vector<128x128xbf16>
    %cst_83 = arith.constant dense<0.000000e+00> : vector<16x128xf32>
    %209 = tpu.matmul %207, %208, %cst_83 {dimension_numbers = #tpu.dot_dimension_numbers<[1], [0], [0], [1], [0, 0, 1, 1], [], []>} : vector<16x128xbf16>, vector<128x128xbf16>, vector<16x128xf32> -> vector<16x128xf32>
    %c0_84 = arith.constant 0 : index
    %c2048_85 = arith.constant 2048 : index
    %210 = vector.load %arg5[%c0_84, %c2048_85] : memref<1x2688xf32, #tpu.memory_space<vmem>>, vector<1x128xf32>
    %211 = vector.broadcast %210 : vector<1x128xf32> to vector<16x128xf32>
    %212 = arith.addf %209, %211 : vector<16x128xf32>
    %213 = arith.truncf %212 : vector<16x128xf32> to vector<16x128xbf16>
    %c0_86 = arith.constant 0 : index
    %c2176 = arith.constant 2176 : index
    %214 = vector.load %arg4[%c0_86, %c2176] : memref<128x2688xbf16, #tpu.memory_space<vmem>>, vector<128x384xbf16>
    %cst_87 = arith.constant dense<0.000000e+00> : vector<16x384xf32>
    %215 = tpu.matmul %213, %214, %cst_87 {dimension_numbers = #tpu.dot_dimension_numbers<[1], [0], [0], [1], [0, 0, 1, 1], [], []>} : vector<16x128xbf16>, vector<128x384xbf16>, vector<16x384xf32> -> vector<16x384xf32>
    %c0_88 = arith.constant 0 : index
    %c2176_89 = arith.constant 2176 : index
    %216 = vector.load %arg5[%c0_88, %c2176_89] : memref<1x2688xf32, #tpu.memory_space<vmem>>, vector<1x384xf32>
    %217 = vector.broadcast %216 : vector<1x384xf32> to vector<16x384xf32>
    %218 = arith.addf %215, %217 : vector<16x384xf32>
    %219 = tpu.iota {dimensions = array<i32: 2>} : vector<2x8x8xi32>
    %c7_i32 = arith.constant 7 : i32
    %220 = vector.broadcast %c7_i32 : i32 to vector<2x8x8xi32>
    %221 = arith.cmpi sge, %219, %220 : vector<2x8x8xi32>
    %cst_90 = arith.constant -1.000000e+09 : f32
    %cst_91 = arith.constant 0.000000e+00 : f32
    %222 = vector.broadcast %cst_90 : f32 to vector<2x8x8xf32>
    %223 = vector.broadcast %cst_91 : f32 to vector<2x8x8xf32>
    %224 = arith.select %221, %222, %223 : vector<2x8x8xi1>, vector<2x8x8xf32>
    %225 = vector.extract_strided_slice %218 {offsets = [0, 0], sizes = [16, 128], strides = [1, 1]} : vector<16x384xf32> to vector<16x128xf32>
    %226 = vector.shape_cast %225 : vector<16x128xf32> to vector<2x8x128xf32>
    %227 = vector.extract_strided_slice %218 {offsets = [0, 128], sizes = [16, 128], strides = [1, 1]} : vector<16x384xf32> to vector<16x128xf32>
    %228 = vector.shape_cast %227 : vector<16x128xf32> to vector<2x8x128xf32>
    %229 = vector.extract_strided_slice %218 {offsets = [0, 256], sizes = [16, 128], strides = [1, 1]} : vector<16x384xf32> to vector<16x128xf32>
    %230 = vector.shape_cast %229 : vector<16x128xf32> to vector<2x8x128xf32>
    %231 = arith.truncf %226 : vector<2x8x128xf32> to vector<2x8x128xbf16>
    %232 = arith.truncf %228 : vector<2x8x128xf32> to vector<2x8x128xbf16>
    "tpu.trace_start"() <{level = 10 : i32, message = "bqd,bkd->bqk"}> : () -> ()
    %cst_92 = arith.constant dense<0.000000e+00> : vector<2x8x8xf32>
    %233 = tpu.matmul %231, %232, %cst_92 {dimension_numbers = #tpu.dot_dimension_numbers<[2], [2], [1], [1], [0, 0, 0, 1, 1, 1], [0], [0]>} : vector<2x8x128xbf16>, vector<2x8x128xbf16>, vector<2x8x8xf32> -> vector<2x8x8xf32>
    "tpu.trace_stop"() : () -> ()
    %cst_93 = arith.constant 1.250000e-01 : f32
    %234 = vector.broadcast %cst_93 : f32 to vector<2x8x8xf32>
    %235 = arith.mulf %233, %234 : vector<2x8x8xf32>
    %236 = arith.addf %235, %224 : vector<2x8x8xf32>
    %cst_94 = arith.constant dense<0xFF800000> : vector<2x8xf32>
    %237 = vector.multi_reduction <maximumf>, %236, %cst_94 [2] : vector<2x8x8xf32> to vector<2x8xf32>
    %238 = vector.shape_cast %237 : vector<2x8xf32> to vector<2x8x1xf32>
    %239 = vector.broadcast %238 : vector<2x8x1xf32> to vector<2x8x8xf32>
    %240 = arith.subf %236, %239 : vector<2x8x8xf32>
    %241 = math.exp %240 : vector<2x8x8xf32>
    %cst_95 = arith.constant dense<0.000000e+00> : vector<2x8xf32>
    %242 = vector.multi_reduction <add>, %241, %cst_95 [2] : vector<2x8x8xf32> to vector<2x8xf32>
    %243 = vector.shape_cast %242 : vector<2x8xf32> to vector<2x8x1xf32>
    %244 = tpu.reciprocal %243 {approx = true} : vector<2x8x1xf32> -> vector<2x8x1xf32>
    %245 = vector.broadcast %244 : vector<2x8x1xf32> to vector<2x8x8xf32>
    %246 = arith.mulf %241, %245 : vector<2x8x8xf32>
    %247 = arith.truncf %246 : vector<2x8x8xf32> to vector<2x8x8xbf16>
    %248 = arith.truncf %230 : vector<2x8x128xf32> to vector<2x8x128xbf16>
    "tpu.trace_start"() <{level = 10 : i32, message = "bqk,bkd->bqd"}> : () -> ()
    %cst_96 = arith.constant dense<0.000000e+00> : vector<2x8x128xf32>
    %249 = tpu.matmul %247, %248, %cst_96 {dimension_numbers = #tpu.dot_dimension_numbers<[2], [1], [1], [2], [0, 0, 0, 1, 1, 2], [0], [0]>} : vector<2x8x8xbf16>, vector<2x8x128xbf16>, vector<2x8x128xf32> -> vector<2x8x128xf32>
    "tpu.trace_stop"() : () -> ()
    %250 = vector.shape_cast %249 : vector<2x8x128xf32> to vector<16x128xf32>
    %251 = arith.truncf %250 : vector<16x128xf32> to vector<16x128xbf16>
    %c0_97 = arith.constant 0 : index
    %c2560 = arith.constant 2560 : index
    %252 = vector.load %arg4[%c0_97, %c2560] : memref<128x2688xbf16, #tpu.memory_space<vmem>>, vector<128x128xbf16>
    %cst_98 = arith.constant dense<0.000000e+00> : vector<16x128xf32>
    %253 = tpu.matmul %251, %252, %cst_98 {dimension_numbers = #tpu.dot_dimension_numbers<[1], [0], [0], [1], [0, 0, 1, 1], [], []>} : vector<16x128xbf16>, vector<128x128xbf16>, vector<16x128xf32> -> vector<16x128xf32>
    %c0_99 = arith.constant 0 : index
    %c2560_100 = arith.constant 2560 : index
    %254 = vector.load %arg5[%c0_99, %c2560_100] : memref<1x2688xf32, #tpu.memory_space<vmem>>, vector<1x128xf32>
    %255 = vector.broadcast %254 : vector<1x128xf32> to vector<16x128xf32>
    %256 = arith.addf %253, %255 : vector<16x128xf32>
    %257 = arith.truncf %256 : vector<16x128xf32> to vector<16x128xbf16>
    %c0_101 = arith.constant 0 : index
    %c1408_102 = arith.constant 1408 : index
    %258 = vector.load %arg4[%c0_101, %c1408_102] : memref<128x2688xbf16, #tpu.memory_space<vmem>>, vector<128x128xbf16>
    %cst_103 = arith.constant dense<0.000000e+00> : vector<16x128xf32>
    %259 = tpu.matmul %257, %258, %cst_103 {dimension_numbers = #tpu.dot_dimension_numbers<[1], [0], [0], [1], [0, 0, 1, 1], [], []>} : vector<16x128xbf16>, vector<128x128xbf16>, vector<16x128xf32> -> vector<16x128xf32>
    %c0_104 = arith.constant 0 : index
    %c1408_105 = arith.constant 1408 : index
    %260 = vector.load %arg5[%c0_104, %c1408_105] : memref<1x2688xf32, #tpu.memory_space<vmem>>, vector<1x128xf32>
    %261 = vector.broadcast %260 : vector<1x128xf32> to vector<16x128xf32>
    %262 = arith.addf %259, %261 : vector<16x128xf32>
    %cst_106 = arith.constant 5.000000e-01 : f32
    %263 = vector.broadcast %cst_106 : f32 to vector<16x128xf32>
    %264 = arith.mulf %263, %262 : vector<16x128xf32>
    %265 = arith.mulf %262, %262 : vector<16x128xf32>
    %266 = arith.mulf %265, %262 : vector<16x128xf32>
    %cst_107 = arith.constant 4.471500e-02 : f32
    %267 = vector.broadcast %cst_107 : f32 to vector<16x128xf32>
    %268 = arith.mulf %267, %266 : vector<16x128xf32>
    %269 = arith.addf %262, %268 : vector<16x128xf32>
    %cst_108 = arith.constant 0.797884583 : f32
    %270 = vector.broadcast %cst_108 : f32 to vector<16x128xf32>
    %271 = arith.mulf %270, %269 : vector<16x128xf32>
    %272 = math.tanh %271 : vector<16x128xf32>
    %cst_109 = arith.constant 1.000000e+00 : f32
    %273 = vector.broadcast %cst_109 : f32 to vector<16x128xf32>
    %274 = arith.addf %273, %272 : vector<16x128xf32>
    %275 = arith.mulf %264, %274 : vector<16x128xf32>
    %276 = arith.truncf %275 : vector<16x128xf32> to vector<16x128xbf16>
    %c0_110 = arith.constant 0 : index
    %c1536_111 = arith.constant 1536 : index
    %277 = vector.load %arg4[%c0_110, %c1536_111] : memref<128x2688xbf16, #tpu.memory_space<vmem>>, vector<128x128xbf16>
    %cst_112 = arith.constant dense<0.000000e+00> : vector<16x128xf32>
    %278 = tpu.matmul %276, %277, %cst_112 {dimension_numbers = #tpu.dot_dimension_numbers<[1], [0], [0], [1], [0, 0, 1, 1], [], []>} : vector<16x128xbf16>, vector<128x128xbf16>, vector<16x128xf32> -> vector<16x128xf32>
    %c0_113 = arith.constant 0 : index
    %c1536_114 = arith.constant 1536 : index
    %279 = vector.load %arg5[%c0_113, %c1536_114] : memref<1x2688xf32, #tpu.memory_space<vmem>>, vector<1x128xf32>
    %280 = vector.broadcast %279 : vector<1x128xf32> to vector<16x128xf32>
    %281 = arith.addf %278, %280 : vector<16x128xf32>
    %282 = vector.shape_cast %281 : vector<16x128xf32> to vector<2x8x128xf32>
    %c0_115 = arith.constant 0 : index
    %c0_116 = arith.constant 0 : index
    %c0_117 = arith.constant 0 : index
    %283 = vector.load %arg7[%c0_115, %c0_116, %c0_117] : memref<2x8x128xf32, #tpu.memory_space<vmem>>, vector<2x8x128xf32>
    tpu.vector_store %arg7[%c0_115, %c0_116, %c0_117], %282 {strides = array<i32>} : memref<2x8x128xf32, #tpu.memory_space<vmem>>, vector<2x8x128xf32>,
    return
  }
  func.func @transform_0(%arg0: i32) -> (i32, i32, i32) {
    %c0_i32 = arith.constant 0 : i32
    %c0_i32_0 = arith.constant 0 : i32
    %c0_i32_1 = arith.constant 0 : i32
    return %arg0, %c0_i32, %c0_i32_0 : i32, i32, i32
  }
  func.func @transform_1(%arg0: i32) -> (i32, i32) {
    %c0_i32 = arith.constant 0 : i32
    %c0_i32_0 = arith.constant 0 : i32
    %c0_i32_1 = arith.constant 0 : i32
    return %c0_i32, %c0_i32_0 : i32, i32
  }
  func.func @transform_2(%arg0: i32) -> (i32, i32) {
    %c0_i32 = arith.constant 0 : i32
    %c0_i32_0 = arith.constant 0 : i32
    %c0_i32_1 = arith.constant 0 : i32
    return %c0_i32, %c0_i32_0 : i32, i32
  }
  func.func @transform_3(%arg0: i32) -> (i32, i32) {
    %c0_i32 = arith.constant 0 : i32
    %c0_i32_0 = arith.constant 0 : i32
    %c0_i32_1 = arith.constant 0 : i32
    return %c0_i32, %c0_i32_0 : i32, i32
  }
  func.func @transform_4(%arg0: i32) -> (i32, i32) {
    %c0_i32 = arith.constant 0 : i32
    %c0_i32_0 = arith.constant 0 : i32
    %c0_i32_1 = arith.constant 0 : i32
    return %c0_i32, %c0_i32_0 : i32, i32
  }
  func.func @transform_5(%arg0: i32) -> (i32, i32, i32) {
    %c0_i32 = arith.constant 0 : i32
    %c0_i32_0 = arith.constant 0 : i32
    %c0_i32_1 = arith.constant 0 : i32
    return %arg0, %c0_i32, %c0_i32_0 : i32, i32, i32
  }
  func.func @transform_6(%arg0: i32) -> (i32, i32, i32) {
    %c0_i32 = arith.constant 0 : i32
    %c0_i32_0 = arith.constant 0 : i32
    %c0_i32_1 = arith.constant 0 : i32
    return %arg0, %c0_i32, %c0_i32_0 : i32, i32, i32
  }
}

</mosaic_0001>

<bundles_post_ra>
// kernel: encoder_pooler_forward.1
= control target key start
LH: loop header
LB: loop body
LE: loop exit
PB: predicated region body
PF: predicated region fallthrough
CT: control target
= control target key end

     0   :  { %12 = vsyncpa [#allocation3], 0  ;;  %s3718_s0 = inlined_call_operand.vmem [shape: f32[2,8,128], index: 0, kind: input, shape index: {}]   ;;  %s3719_s1 = inlined_call_operand.vmem [shape: f32[8,128], index: 1, kind: input, shape index: {}]   ;;  %s3720_s2 = inlined_call_operand.hbm [shape: f32[8,128], index: 2, kind: input, shape index: {}]   ;;  %s3721_s3 = inlined_call_operand.hbm [shape: bf16[128,2688], index: 3, kind: input, shape index: {}]   ;;  %s3722_s4 = inlined_call_operand.vmem [shape: f32[1,2688], index: 4, kind: input, shape index: {}]   ;;  %s3723_s5 = inlined_call_operand.vmem [shape: f32[2,8,128], index: 5, kind: output, shape index: {0}]   ;;  %s3724_s6 = inlined_call_operand.vmem [shape: f32[2,8,128], index: 6, kind: output, shape index: {1}]  }
   0x1   :  { %s23_s23 = sshll.u32 %s3720_s2, 4  ;;  %s24_s23 = int_to_ptr.hbm [resolvable:$true] %s23_s23 }
   0x2   :  { %13 = vsyncpa [#allocation5], 0  ;;  %s3528_s24 = smov [#allocation2]   ;;  %s33_s28 = sshll.u32 %s3721_s3, 4  ;;  %s34_s28 = int_to_ptr.hbm [resolvable:$true] %s33_s28 }
   0x3   :  { %s25_s25 = sshll.u32 %s3528_s24, 4  ;;  %s3529_s29 = smov [#allocation4]   ;;  %s26_s25 = int_to_ptr.vmem [resolvable:$true] %s25_s25 }
   0x4   :  { %28 = dma.hbm_to_vmem [thread:$0]  %s24_s23, 128, %s26_s25, [#allocation3]  }
   0x5   :  { %s35_s30 = sshll.u32 %s3529_s29, 4  ;;  %s3530_s7 = smov 1344   ;;  %s36_s30 = int_to_ptr.vmem [resolvable:$true] %s35_s30 }
   0x6   :  { %s3531_s8 = smov 84  }
   0x7   :  { %41 = dma.hbm_to_vmem [thread:$0]  %s34_s28, 21504, %s36_s30, [#allocation5], %s3530_s7, %s3530_s7, %s3531_s8  }
   0x8   :  { %3524 = dma.done.wait [#allocation3], 128  }
   0x9   :  { %3525 = vsyncadd [#allocation3], 4294967168 }
   0xa   :  { %3526 = dma.done.wait [#allocation5], 21504  }
   0xb   :  { %3527 = vsyncadd [#allocation5], 4294945792  ;;  %v2584_v0 = vld [vmem:[#allocation4 + $0x4a0] sm:$0xf]  ;;  %v3250_v1 = vld [vmem:[#allocation4 + $0x4f0] sm:$0xf0] }
   0xc   :  { %v3248_v2 = vld [vmem:[#allocation4 + $0x4a4] sm:$0xf]  ;;  %v2585_v3 = vor.u32 %v3250_v1, %v2584_v0  ;;  %v2586_v4 = vld [vmem:[#allocation4 + $0x4f4] sm:$0xf0]  ;;  %v3245_v6 = vld [vmem:[#allocation4 + $0x448] sm:$0xf0] }
   0xd   :  { %v2564_v5 = vld [vmem:[#allocation4 + $0x3f8] sm:$0xf]  ;;  %v2589_v7 = vor.u32 %v3248_v2, %v2586_v4  ;;  %v3243_v8 = vld [vmem:[#allocation4 + $0x3fc] sm:$0xf]  ;;  %v2566_v9 = vld [vmem:[#allocation4 + $0x44c] sm:$0xf0] }
   0xe   :  { %352 = vmatpush.bf16.msra.mxu2 %v2585_v3  ;;  %v2565_v10 = vor.u32 %v3245_v6, %v2564_v5  ;;  %v2569_v11 = vor.u32 %v3243_v8, %v2566_v9  ;;  %v2544_v12 = vld [vmem:[#allocation4 + $0x350] sm:$0xf]  ;;  %v3240_v13 = vld [vmem:[#allocation4 + $0x3a0] sm:$0xf0]  ;;  %v3238_v14 = vld [vmem:[#allocation4 + $0x354] sm:$0xf] }
   0xf   :  { %366 = vmatpush.bf16.msra.mxu3 %v2589_v7  ;;  %v2546_v15 = vld [vmem:[#allocation4 + $0x3a4] sm:$0xf0]  ;;  %v2545_v16 = vor.u32 %v3240_v13, %v2544_v12  ;;  %v3235_v19 = vld [vmem:[#allocation4 + $0x2f8] sm:$0xf0]  ;;  %v3233_v20 = vld [vmem:[#allocation4 + $0x2ac] sm:$0xf] }
  0x10   :  { %v2549_v17 = vor.u32 %v3238_v14, %v2546_v15  ;;  %v2524_v18 = vld [vmem:[#allocation4 + $0x2a8] sm:$0xf]  ;;  %v2526_v21 = vld [vmem:[#allocation4 + $0x2fc] sm:$0xf0]  ;;  %v3247_v24 = vld [vmem:[#allocation4 + $0x49c] sm:$0xf] }
  0x11   :  { %v2525_v22 = vor.u32 %v3235_v19, %v2524_v18  ;;  %v2504_v23 = vld [vmem:[#allocation4 + $0x200] sm:$0xf]  ;;  %v2578_v25 = vld [vmem:[#allocation4 + $0x4ec] sm:$0xf0]  ;;  %v2529_v26 = vor.u32 %v3233_v20, %v2526_v21  ;;  %v3230_v27 = vld [vmem:[#allocation4 + $0x250] sm:$0xf0] }
  0x12   :  { %353 = vmatpush.bf16.msra.mxu2 %v2565_v10  ;;  %v2581_v28 = vor.u32 %v3247_v24, %v2578_v25  ;;  %v3242_v29 = vld [vmem:[#allocation4 + $0x3f4] sm:$0xf]  ;;  %v2558_v30 = vld [vmem:[#allocation4 + $0x444] sm:$0xf0]  ;;  %v3228_v31 = vld [vmem:[#allocation4 + $0x204] sm:$0xf]  ;;  %v2505_v34 = vor.u32 %v3230_v27, %v2504_v23 }
  0x13   :  { %367 = vmatpush.bf16.msra.mxu3 %v2569_v11  ;;  %v2506_v32 = vld [vmem:[#allocation4 + $0x254] sm:$0xf0]  ;;  %v2561_v33 = vor.u32 %v3242_v29, %v2558_v30  ;;  %v3237_v36 = vld [vmem:[#allocation4 + $0x34c] sm:$0xf]  ;;  %v2538_v37 = vld [vmem:[#allocation4 + $0x39c] sm:$0xf0] }
  0x14   :  { %338 = vmatpush.bf16.msra.mxu1 %v2581_v28  ;;  %v2484_v35 = vld [vmem:[#allocation4 + $0x158] sm:$0xf]  ;;  %v2509_v38 = vor.u32 %v3228_v31, %v2506_v32  ;;  %v3225_v39 = vld [vmem:[#allocation4 + $0x1a8] sm:$0xf0]  ;;  %v3223_v40 = vld [vmem:[#allocation4 + $0x15c] sm:$0xf]  ;;  %v2541_v46 = vor.u32 %v3237_v36, %v2538_v37 }
  0x15   :  { %v2486_v41 = vld [vmem:[#allocation4 + $0x1ac] sm:$0xf0]  ;;  %v3232_v42 = vld [vmem:[#allocation4 + $0x2a4] sm:$0xf]  ;;  %v2518_v43 = vld [vmem:[#allocation4 + $0x2f4] sm:$0xf0]  ;;  %v2485_v47 = vor.u32 %v3225_v39, %v2484_v35 }
  0x16   :  { %354 = vmatpush.bf16.msra.mxu2 %v2545_v16  ;;  %v2464_v44 = vld [vmem:[#allocation4 + $0xb0] sm:$0xf]  ;;  %v3220_v45 = vld [vmem:[#allocation4 + $0x100] sm:$0xf0]  ;;  %v2489_v48 = vor.u32 %v3223_v40, %v2486_v41  ;;  %v3218_v49 = vld [vmem:[#allocation4 + $0xb4] sm:$0xf]  ;;  %v2521_v51 = vor.u32 %v3232_v42, %v2518_v43 }
  0x17   :  { %368 = vmatpush.bf16.msra.mxu3 %v2549_v17  ;;  %v2466_v50 = vld [vmem:[#allocation4 + $0x104] sm:$0xf0]  ;;  %v2465_v52 = vor.u32 %v3220_v45, %v2464_v44  ;;  %v3227_v53 = vld [vmem:[#allocation4 + $0x1fc] sm:$0xf]  ;;  %v2498_v54 = vld [vmem:[#allocation4 + $0x24c] sm:$0xf0] }
  0x18   :  { %339 = vmatpush.bf16.msra.mxu1 %v2561_v33  ;;  %v2469_v55 = vor.u32 %v3218_v49, %v2466_v50  ;;  %v2444_v56 = vld [vmem:[#allocation4 + $0x8] sm:$0xf]  ;;  %v3215_v57 = vld [vmem:[#allocation4 + $0x58] sm:$0xf0]  ;;  %v3213_v58 = vld [vmem:[#allocation4 + $0xc] sm:$0xf]  ;;  %v2501_v61 = vor.u32 %v3227_v53, %v2498_v54 }
  0x19   :  { %v2446_v59 = vld [vmem:[#allocation4 + $0x5c] sm:$0xf0]  ;;  %v53_v60 = vld [vmem:[%s3718_s0] sm:$0xff]  ;;  %v2445_v62 = vor.u32 %v3215_v57, %v2444_v56  ;;  %v3222_v0 = vld [vmem:[#allocation4 + $0x154] sm:$0xf]  ;;  %vm426_vm0 = vcmask 64512  }
  0x1a   :  { %355 = vmatpush.bf16.msra.mxu2 %v2525_v22  ;;  %v54_v63 = vld [vmem:[%s3718_s0 + $0x8] sm:$0xff]  ;;  %v2478_v1 = vld [vmem:[#allocation4 + $0x1a4] sm:$0xf0]  ;;  %v2449_v2 = vor.u32 %v3213_v58, %v2446_v59  ;;  %v3217_v5 = vld [vmem:[#allocation4 + $0xac] sm:$0xf]  ;;  %vm456_vm1 = vcmask 1043456  }
  0x1b   :  { %369 = vmatpush.bf16.msra.mxu3 %v2529_v26  ;;  %v3580_v3 = vpack.c.bf16 %v54_v63, %v53_v60  ;;  %v2481_v4 = vor.u32 %v3222_v0, %v2478_v1  ;;  %v2458_v6 = vld [vmem:[#allocation4 + $0xfc] sm:$0xf0]  ;;  %v3212_v8 = vld [vmem:[#allocation4 + $0x4] sm:$0xf]  ;;  %v2438_v9 = vld [vmem:[#allocation4 + $0x54] sm:$0xf0] }
  0x1c   :  { %340 = vmatpush.bf16.msra.mxu1 %v2541_v46  ;;  %v2461_v7 = vor.u32 %v3217_v5, %v2458_v6  ;;  %v2441_v10 = vor.u32 %v3212_v8, %v2438_v9  ;;  %v3588_v11 = vld [vmem:[%s3722_s4] sm:$0x1f]  ;;  %v3249_v28 = vld [vmem:[#allocation4 + $0x4e8] sm:$0xf0]  ;;  %v2556_v29 = vld [vmem:[#allocation4 + $0x3f0] sm:$0xf] }
  0x1d   :  { %v109_v12 = vperm.slane %v3588_v11, 3  ;;  %v108_v13 = vperm.slane %v3588_v11, 2  ;;  %v2576_v27 = vld [vmem:[#allocation4 + $0x498] sm:$0xf]  ;;  %v3244_v31 = vld [vmem:[#allocation4 + $0x440] sm:$0xf0] }
  0x1e   :  { %356 = vmatpush.bf16.msra.mxu2 %v2505_v34  ;;  %v2577_v30 = vor.u32 %v3249_v28, %v2576_v27  ;;  %v2557_v33 = vor.u32 %v3244_v31, %v2556_v29  ;;  %v2536_v34 = vld [vmem:[#allocation4 + $0x348] sm:$0xf]  ;;  %v3239_v35 = vld [vmem:[#allocation4 + $0x398] sm:$0xf0]  ;;  %v2516_v37 = vld [vmem:[#allocation4 + $0x2a0] sm:$0xf] }
  0x1f   :  { %370 = vmatpush.bf16.msra.mxu3 %v2509_v38  ;;  %v2537_v36 = vor.u32 %v3239_v35, %v2536_v34  ;;  %v3234_v38 = vld [vmem:[#allocation4 + $0x2f0] sm:$0xf0]  ;;  %v2496_v42 = vld [vmem:[#allocation4 + $0x1f8] sm:$0xf]  ;;  %v3229_v43 = vld [vmem:[#allocation4 + $0x248] sm:$0xf0] }
  0x20   :  { %341 = vmatpush.bf16.msra.mxu1 %v2521_v51  ;;  %324 = vmatpush.bf16.msra.mxu0 %v2577_v30  ;;  %v2517_v41 = vor.u32 %v3234_v38, %v2516_v37  ;;  %v2497_v45 = vor.u32 %v3229_v43, %v2496_v42  ;;  %v2476_v46 = vld [vmem:[#allocation4 + $0x150] sm:$0xf]  ;;  %v2456_v50 = vld [vmem:[#allocation4 + $0xa8] sm:$0xf]  ;;  %v3219_v51 = vld [vmem:[#allocation4 + $0xf8] sm:$0xf0] }
  0x21   :  { %v2436_v54 = vld [vmem:[#allocation4] sm:$0xf]  ;;  %v2592_v57 = vld [vmem:[#allocation4 + $0x4a8] sm:$0xf]  ;;  %v3251_v58 = vld [vmem:[#allocation4 + $0x4f8] sm:$0xf0] }
  0x22   :  { %357 = vmatpush.bf16.msra.mxu2 %v2485_v47  ;;  %v3224_v47 = vld [vmem:[#allocation4 + $0x1a0] sm:$0xf0]  ;;  %v3246_v63 = vld [vmem:[#allocation4 + $0x450] sm:$0xf0]  ;;  %v2532_v6 = vld [vmem:[#allocation4 + $0x2b0] sm:$0xf] }
  0x23   :  { %371 = vmatpush.bf16.msra.mxu3 %v2489_v48  ;;  %v2477_v49 = vor.u32 %v3224_v47, %v2476_v46  ;;  %v2512_v9 = vld [vmem:[#allocation4 + $0x208] sm:$0xf] }
  0x24   :  { %342 = vmatpush.bf16.msra.mxu1 %v2501_v61  ;;  %325 = vmatpush.bf16.msra.mxu0 %v2557_v33  ;;  %v2593_v61 = vor.u32 %v3251_v58, %v2592_v57  ;;  %v3259_v57 = vld [vmem:[#allocation4 + $0x510] sm:$0xf0]  ;;  %v2622_v58 = vld [vmem:[#allocation4 + $0x418] sm:$0xf] }
  0x26   :  { %358 = vmatpush.bf16.msra.mxu2 %v2465_v52  ;;  %v2457_v52 = vor.u32 %v3219_v51, %v2456_v50 }
  0x27   :  { %372 = vmatpush.bf16.msra.mxu3 %v2469_v55  ;;  %v3214_v55 = vld [vmem:[#allocation4 + $0x50] sm:$0xf0] }
  0x28   :  { %343 = vmatpush.bf16.msra.mxu1 %v2481_v4  ;;  %326 = vmatpush.bf16.msra.mxu0 %v2537_v36  ;;  %v2437_v60 = vor.u32 %v3214_v55, %v2436_v54  ;;  %v3241_v4 = vld [vmem:[#allocation4 + $0x3a8] sm:$0xf0]  ;;  %v110_v36 = vperm.slane %v3588_v11, 4 }
  0x2a   :  { %359 = vmatpush.bf16.msra.mxu2 %v2445_v62  ;;  %v2572_v62 = vld [vmem:[#allocation4 + $0x400] sm:$0xf] }
  0x2b   :  { %373 = vmatpush.bf16.msra.mxu3 %v2449_v2  ;;  %v2573_v1 = vor.u32 %v3246_v63, %v2572_v62  ;;  %v2552_v2 = vld [vmem:[#allocation4 + $0x358] sm:$0xf]  ;;  %v2618_v63 = vld [vmem:[#allocation4 + $0x370] sm:$0xf] }
  0x2c   :  { %344 = vmatpush.bf16.msra.mxu1 %v2461_v7  ;;  %327 = vmatpush.bf16.msra.mxu0 %v2517_v41  ;;  %v2553_v5 = vor.u32 %v3241_v4, %v2552_v2  ;;  %v3236_v7 = vld [vmem:[#allocation4 + $0x300] sm:$0xf0]  ;;  %v2614_v2 = vld [vmem:[#allocation4 + $0x2c8] sm:$0xf]  ;;  %v3256_v4 = vld [vmem:[#allocation4 + $0x318] sm:$0xf0] }
  0x2d   :  { %360 = vmatmul.bf16.vlgmr.msra.gmra.mxu2 %v3580_v3  ;;  %v2533_v8 = vor.u32 %v3236_v7, %v2532_v6  ;;  %v577_v6 = vld [vmem:[%s3719_s1] sm:$0xff]  ;;  %v2615_v7 = vor.u32 %v3256_v4, %v2614_v2  ;;  %v3263_v2 = vld [vmem:[#allocation4 + $0x25c] sm:$0xf0] }
  0x2e   :  { %374 = vmatmul.bf16.vlgmr.msra.gmra.mxu3 %v3580_v3 }
  0x30   :  { %345 = vmatpush.bf16.msra.mxu1 %v2441_v10  ;;  %328 = vmatpush.bf16.msra.mxu0 %v2497_v45  ;;  %v3231_v10 = vld [vmem:[#allocation4 + $0x258] sm:$0xf0] }
  0x33   :  { %346 = vmatmul.bf16.vlgmr.msra.gmra.mxu1 %v3580_v3 }
  0x34   :  { %329 = vmatpush.bf16.msra.mxu0 %v2477_v49  ;;  %v107_v49 = vperm.slane %v3588_v11, 1 }
  0x38   :  { %330 = vmatpush.bf16.msra.mxu0 %v2457_v52 }
  0x3c   :  { %331 = vmatpush.bf16.msra.mxu0 %v2437_v60  ;;  %v3258_v60 = vld [vmem:[#allocation4 + $0x468] sm:$0xf0] }
  0x3f   :  { %332 = vmatmul.bf16.vlgmr.msra.gmra.mxu0 %v3580_v3 }
  0x40   :  { %380 = vmatpush.bf16.msrb.mxu0 %v2593_v61 }
  0x44   :  { %381 = vmatpush.bf16.msrb.mxu0 %v2573_v1 }
  0x48   :  { %382 = vmatpush.bf16.msrb.mxu0 %v2553_v5 }
  0x4c   :  { %383 = vmatpush.bf16.msrb.mxu0 %v2533_v8 }
  0xb0   :  { %v361_v15 = vpop.f32.mrf.mxu2  ;;  %v3592_v26 = vpop.f32.mrf.mxu1 }
  0xb1   :  { %v375_v14 = vpop.f32.mrf.mxu3  ;;  %v362_v18 = vadd.f32 %v361_v15, %v108_v13  ;;  %v348_v1 = vadd.f32 %v3592_v26, %v107_v49  ;;  %v2606_v26 = vld [vmem:[#allocation4 + $0x178] sm:$0xf] }
  0xb2   :  { %v376_v16 = vadd.f32 %v375_v14, %v109_v12  ;;  %v3226_v14 = vld [vmem:[#allocation4 + $0x1b0] sm:$0xf0] }
  0xb3   :  { %v394_v19 = vpack.c.bf16 %v362_v18, %v362_v18  ;;  %v633_v8 = vpack.c.bf16 %v348_v1, %v348_v1  ;;  %v2644_v1 = vld [vmem:[#allocation4 + $0x20c] sm:$0xf] }
  0xb4   :  { %v396_v17 = vpack.c.bf16 %v376_v16, %v376_v16  ;;  %v2472_v16 = vld [vmem:[#allocation4 + $0xb8] sm:$0xf]  ;;  %v2645_v4 = vor.u32 %v3263_v2, %v2644_v1  ;;  %v3294_v2 = vld [vmem:[#allocation4 + $0x410] sm:$0xf] }
  0xb6   :  { %405 = vmatpush.bf16.xpose.msrb.mxu1 %v396_v17  ;;  %v3221_v17 = vld [vmem:[#allocation4 + $0x108] sm:$0xf0] }
  0xb7   :  { %v2473_v18 = vor.u32 %v3221_v17, %v2472_v16  ;;  %v639_v16 = vsel %vm456_vm1, %v633_v8, 0  ;;  %v3254_v17 = vld [vmem:[#allocation4 + $0x1c8] sm:$0xf0] }
  0xb8   :  { %v363_v22 = vpop.f32.mrf.mxu2  ;;  %v3594_v32 = vpop.f32.mrf.mxu1 }
  0xb9   :  { %v377_v20 = vpop.f32.mrf.mxu3  ;;  %v364_v24 = vadd.f32 %v363_v22, %v108_v13  ;;  %v2492_v13 = vld [vmem:[#allocation4 + $0x160] sm:$0xf]  ;;  %v350_v51 = vadd.f32 %v3594_v32, %v107_v49 }
  0xba   :  { %v378_v21 = vadd.f32 %v377_v20, %v109_v12  ;;  %v2513_v12 = vor.u32 %v3231_v10, %v2512_v9  ;;  %v2493_v15 = vor.u32 %v3226_v14, %v2492_v13  ;;  %v3216_v20 = vld [vmem:[#allocation4 + $0x60] sm:$0xf0]  ;;  %v2610_v10 = vld [vmem:[#allocation4 + $0x220] sm:$0xf]  ;;  %v578_v14 = vpack.c.bf16 %v577_v6, %v577_v6  ;;  %v3262_v6 = vld [vmem:[#allocation4 + $0x1b4] sm:$0xf0] }
  0xbb   :  { %v395_v25 = vpack.c.bf16 %v364_v24, %v364_v24 }
  0xbc   :  { %v397_v23 = vpack.c.bf16 %v378_v21, %v378_v21  ;;  %384 = vmatpush.bf16.msrb.mxu0 %v2513_v12  ;;  %v333_v34 = vpop.f32.mrf.mxu0  ;;  %v3255_v12 = vld [vmem:[#allocation4 + $0x270] sm:$0xf0] }
  0xbd   :  { %406 = vmatmul.bf16.vlgmr.msrb.gmra.mxu1 %v394_v19  ;;  %v2452_v19 = vld [vmem:[#allocation4 + $0x10] sm:$0xf] }
  0xbe   :  { %418 = vmatpush.bf16.xpose.msrb.mxu2 %v397_v23  ;;  %v2453_v21 = vor.u32 %v3216_v20, %v2452_v19  ;;  %v2602_v19 = vld [vmem:[#allocation4 + $0xd0] sm:$0xf]  ;;  %v3253_v20 = vld [vmem:[#allocation4 + $0x120] sm:$0xf0] }
  0xc0   :  { %385 = vmatpush.bf16.msrb.mxu0 %v2493_v15  ;;  %v2611_v15 = vor.u32 %v3255_v12, %v2610_v10  ;;  %v2636_v12 = vld [vmem:[#allocation4 + $0xbc] sm:$0xf] }
  0xc4   :  { %386 = vmatpush.bf16.msrb.mxu0 %v2473_v18  ;;  %v335_v35 = vpop.f32.mrf.mxu0  ;;  %v2607_v18 = vor.u32 %v3254_v17, %v2606_v26 }
  0xc5   :  { %419 = vmatmul.bf16.vlgmr.msrb.gmra.mxu2 %v395_v25 }
  0xc8   :  { %387 = vmatpush.bf16.msrb.mxu0 %v2453_v21  ;;  %v2603_v21 = vor.u32 %v3253_v20, %v2602_v19  ;;  %v3260_v19 = vld [vmem:[#allocation4 + $0x64] sm:$0xf0] }
  0xcb   :  { %388 = vmatmul.bf16.vlgmr.msrb.gmra.mxu0 %v3580_v3  ;;  %v106_v3 = vperm.slane %v3588_v11, 0  ;;  %v2623_v11 = vor.u32 %v3258_v60, %v2622_v58  ;;  %v3266_v58 = vld [vmem:[#allocation4 + $0x454] sm:$0xf0]  ;;  %v2652_v60 = vld [vmem:[#allocation4 + $0x35c] sm:$0xf] }
  0xcd   :  { %v334_v37 = vadd.f32 %v333_v34, %v106_v3  ;;  %v336_v43 = vadd.f32 %v335_v35, %v106_v3 }
  0xcf   :  { %v580_v46 = vpack.c.bf16 %v336_v43, %v336_v43 }
 0x13a   :  { %v407_v39 = vpop.f32.mrf.mxu1 }
 0x13b   :  { %v3596_v40 = vmul.f32 0.125, %v407_v39 }
 0x13d   :  { %v427_v44 = vsel %vm426_vm0, %v3596_v40, -inf }
 0x13e   :  { %428 = vmax.xlane.f32.xlu0 %v427_v44 }
 0x142   :  { %v409_v48 = vpop.f32.mrf.mxu1 }
 0x148   :  { %v420_v53 = vpop.f32.mrf.mxu2  ;;  %v389_v38 = vpop.f32.mrf.mxu0 }
 0x149   :  { %v425_v56 = vmul.f32 0.125, %v420_v53  ;;  %v390_v39 = vadd.f32 %v389_v38, %v110_v36  ;;  %v634_v53 = vpack.c.bf16 %v350_v51, %v350_v51 }
 0x14b   :  { %v430_v59 = vsel %vm426_vm0, %v425_v56, -inf  ;;  %v451_v41 = vpack.c.bf16 %v390_v39, %v390_v39  ;;  %v658_v61 = vsel %vm456_vm1, %v634_v53, 0  ;;  %v3409_v39 = vld [vmem:[%s3722_s4 + $0xa] ss:$0 sm:$0xff] }
 0x14c   :  { %431 = vmax.xlane.f32.xlu0 %v430_v59 }
 0x14d   :  { %v458_v42 = vsel %vm456_vm1, %v451_v41, 0 }
 0x14e   :  { %467 = vmatpush.bf16.msrb.mxu3 %v458_v42 }
 0x150   :  { %v422_v0 = vpop.f32.mrf.mxu2  ;;  %v391_v44 = vpop.f32.mrf.mxu0 }
 0x151   :  { %v392_v45 = vadd.f32 %v391_v44, %v110_v36  ;;  %v3257_v0 = vld [vmem:[#allocation4 + $0x3c0] sm:$0xf0] }
 0x152   :  { %v2619_v32 = vor.u32 %v3257_v0, %v2618_v63  ;;  %v3264_v63 = vld [vmem:[#allocation4 + $0x304] sm:$0xf0] }
 0x153   :  { %v452_v47 = vpack.c.bf16 %v392_v45, %v392_v45 }
 0x155   :  { %v477_v48 = vsel %vm456_vm1, %v452_v47, 0 }
 0x156   :  { %486 = vmatpush.bf16.msra.mxu1 %v477_v48 }
 0x15a   :  { %601 = vmatpush.bf16.xpose.msrb.mxu1 %v580_v46 }
 0x1b1   :  { %v429_v22 = vpop.xlane.xlu0 %428 }
 0x1b2   :  { %v433_v23 = vsub.f32 %v3596_v40, %v429_v22  ;;  %v579_v40 = vpack.c.bf16 %v334_v37, %v334_v37  ;;  %v2598_v22 = vld [vmem:[#allocation4 + $0x28] sm:$0xf] }
 0x1b4   :  { %v435_v24 = vmul.f32 1.442695, %v433_v23  ;;  %588 = vmatpush.bf16.xpose.msra.mxu3 %v579_v40  ;;  %v3252_v23 = vld [vmem:[#allocation4 + $0x78] sm:$0xf0] }
 0x1b6   :  { %3420 = vpow2.f32 %v435_v24  ;;  %v2599_v24 = vor.u32 %v3252_v23, %v2598_v22 }
 0x1bc   :  { %v3421_v25 = vpop.eup %3420 }
 0x1bd   :  { %v439_v27 = vsel %vm426_vm0, %v3421_v25, 0.0 }
 0x1be   :  { %440 = vadd.xlane.f32.xlu1 %v439_v27 }
 0x1bf   :  { %v432_v28 = vpop.xlane.xlu0 %431 }
 0x1c0   :  { %v434_v29 = vsub.f32 %v425_v56, %v432_v28  ;;  %v2626_v56 = vld [vmem:[#allocation4 + $0x4c0] sm:$0xf] }
 0x1c1   :  { %v2627_v59 = vor.u32 %v3259_v57, %v2626_v56  ;;  %v2656_v56 = vld [vmem:[#allocation4 + $0x404] sm:$0xf] }
 0x1c2   :  { %v437_v30 = vmul.f32 1.442695, %v434_v29 }
 0x1c3   :  { %561 = vmatpush.bf16.msra.mxu2 %v2627_v59  ;;  %v2657_v59 = vor.u32 %v3266_v58, %v2656_v56  ;;  %v3297_v56 = vld [vmem:[#allocation4 + $0x4b8] sm:$0xf] }
 0x1c4   :  { %3422 = vpow2.f32 %v437_v30 }
 0x1c7   :  { %562 = vmatpush.bf16.msra.mxu2 %v2623_v11 }
 0x1ca   :  { %v3423_v31 = vpop.eup %3422 }
 0x1cb   :  { %v442_v33 = vsel %vm426_vm0, %v3423_v31, 0.0  ;;  %563 = vmatpush.bf16.msra.mxu2 %v2619_v32 }
 0x1cc   :  { %443 = vadd.xlane.f32.xlu1 %v442_v33 }
 0x1cf   :  { %564 = vmatpush.bf16.msra.mxu2 %v2615_v7 }
 0x1d3   :  { %565 = vmatpush.bf16.msra.mxu2 %v2611_v15 }
 0x1d7   :  { %566 = vmatpush.bf16.msra.mxu2 %v2607_v18  ;;  %v2632_v18 = vld [vmem:[#allocation4 + $0x14] sm:$0xf] }
 0x1d8   :  { %v2633_v20 = vor.u32 %v3260_v19, %v2632_v18 }
 0x1db   :  { %567 = vmatpush.bf16.msra.mxu2 %v2603_v21 }
 0x1df   :  { %568 = vmatpush.bf16.msra.mxu2 %v2599_v24 }
 0x231   :  { %v441_v50 = vpop.xlane.xlu1 %440 }
 0x232   :  { %3424 = vrcp.f32 %v441_v50 }
 0x238   :  { %v3425_v52 = vpop.eup %3424 }
 0x239   :  { %v447_v54 = vmul.f32 %v3425_v52, %v3421_v25 }
 0x23b   :  { %v449_v55 = vpack.c.bf16 %v447_v54, %v447_v54  ;;  %v2660_v54 = vld [vmem:[#allocation4 + $0x4ac] sm:$0xf] }
 0x23d   :  { %2594 = vmatmul.msk.bf16.vlgmr.msrb.gmra.mxu3 %vm426_vm0, %v449_v55  ;;  %v3267_v55 = vld [vmem:[#allocation4 + $0x4fc] sm:$0xf0] }
 0x23e   :  { %667 = vmatpush.bf16.msrb.mxu3 %v658_v61  ;;  %v2661_v57 = vor.u32 %v3267_v55, %v2660_v54  ;;  %v3265_v61 = vld [vmem:[#allocation4 + $0x3ac] sm:$0xf0]  ;;  %v2780_v54 = vld [vmem:[#allocation4 + $0x4b4] sm:$0xf]  ;;  %v3298_v55 = vld [vmem:[#allocation4 + $0x504] sm:$0xf0] }
 0x23f   :  { %v444_v62 = vpop.xlane.xlu1 %443  ;;  %v2653_v11 = vor.u32 %v3265_v61, %v2652_v60  ;;  %v2781_v58 = vor.u32 %v3298_v55, %v2780_v54  ;;  %v2788_v60 = vld [vmem:[#allocation4 + $0x4bc] sm:$0xf] }
 0x240   :  { %3426 = vrcp.f32 %v444_v62  ;;  %742 = vmatpush.bf16.msra.mxu0 %v2661_v57  ;;  %v2648_v62 = vld [vmem:[#allocation4 + $0x2b4] sm:$0xf] }
 0x241   :  { %v2649_v0 = vor.u32 %v3264_v63, %v2648_v62  ;;  %v2768_v62 = vld [vmem:[#allocation4 + $0x40c] sm:$0xf]  ;;  %v3295_v63 = vld [vmem:[#allocation4 + $0x45c] sm:$0xf0]  ;;  %1026 = vmatpush.bf16.msrb.mxu2 %v2781_v58 }
 0x242   :  { %v2769_v1 = vor.u32 %v3295_v63, %v2768_v62  ;;  %v3283_v58 = vld [vmem:[#allocation4 + $0x1bc] sm:$0xf0]  ;;  %v3284_v62 = vld [vmem:[#allocation4 + $0x1c4] sm:$0xf0] }
 0x244   :  { %743 = vmatpush.bf16.msra.mxu0 %v2657_v59  ;;  %v2782_v59 = vld [vmem:[#allocation4 + $0x508] sm:$0xf0] }
 0x245   :  { %v2785_v61 = vor.u32 %v3297_v56, %v2782_v59  ;;  %1027 = vmatpush.bf16.msrb.mxu2 %v2769_v1  ;;  %v3282_v59 = vld [vmem:[#allocation4 + $0x170] sm:$0xf]  ;;  %v3280_v1 = vld [vmem:[#allocation4 + $0x114] sm:$0xf0] }
 0x246   :  { %v3427_v5 = vpop.eup %3426 }
 0x247   :  { %v448_v9 = vmul.f32 %v3427_v5, %v3423_v31  ;;  %v2640_v5 = vld [vmem:[#allocation4 + $0x164] sm:$0xf] }
 0x248   :  { %744 = vmatpush.bf16.msra.mxu0 %v2653_v11  ;;  %v2641_v8 = vor.u32 %v3262_v6, %v2640_v5  ;;  %v3299_v11 = vld [vmem:[#allocation4 + $0x50c] sm:$0xf0]  ;;  %v2776_v5 = vld [vmem:[#allocation4 + $0x414] sm:$0xf] }
 0x249   :  { %v450_v13 = vpack.c.bf16 %v448_v9, %v448_v9 }
 0x24b   :  { %2595 = vmatmul.msk.bf16.vlgmr.msra.gmra.mxu1 %vm426_vm0, %v450_v13  ;;  %v3261_v13 = vld [vmem:[#allocation4 + $0x10c] sm:$0xf0] }
 0x24c   :  { %648 = vmatpush.bf16.msra.mxu1 %v639_v16  ;;  %745 = vmatpush.bf16.msra.mxu0 %v2649_v0  ;;  %v2637_v15 = vor.u32 %v3261_v13, %v2636_v12  ;;  %v3291_v13 = vld [vmem:[#allocation4 + $0x368] sm:$0xf] }
 0x24d   :  { %589 = vmatmul.bf16.vlgmr.msra.gmra.mxu3 %v578_v14 }
 0x24e   :  { %1040 = vmatpush.bf16.msra.mxu3 %v2785_v61  ;;  %v2722_v61 = vld [vmem:[#allocation4 + $0x1c0] sm:$0xf0] }
 0x24f   :  { %v2725_v63 = vor.u32 %v3282_v59, %v2722_v61 }
 0x250   :  { %746 = vmatpush.bf16.msra.mxu0 %v2645_v4  ;;  %v2770_v4 = vld [vmem:[#allocation4 + $0x460] sm:$0xf0] }
 0x251   :  { %v2773_v6 = vor.u32 %v3294_v2, %v2770_v4  ;;  %v3279_v2 = vld [vmem:[#allocation4 + $0xc8] sm:$0xf]  ;;  %v2710_v4 = vld [vmem:[#allocation4 + $0x118] sm:$0xf0] }
 0x253   :  { %1041 = vmatpush.bf16.msra.mxu3 %v2773_v6  ;;  %v3281_v6 = vld [vmem:[#allocation4 + $0x11c] sm:$0xf0] }
 0x254   :  { %747 = vmatpush.bf16.msra.mxu0 %v2641_v8  ;;  %v2756_v8 = vld [vmem:[#allocation4 + $0x364] sm:$0xf] }
 0x258   :  { %748 = vmatpush.bf16.msra.mxu0 %v2637_v15 }
 0x25b   :  { %602 = vmatmul.bf16.vlgmr.msrb.gmra.mxu1 %v578_v14 }
 0x25c   :  { %749 = vmatpush.bf16.msra.mxu0 %v2633_v20 }
 0x2c0   :  { %v469_v25 = vpop.f32.mrf.mxu3 }
 0x2c8   :  { %v471_v27 = vpop.f32.mrf.mxu3  ;;  %v488_v28 = vpop.f32.mrf.mxu1 }
 0x2c9   :  { %v492_v29 = vpack.c.bf16 %v488_v28, %v469_v25  ;;  %v2692_v27 = vld [vmem:[#allocation4 + $0x4b0] sm:$0xf]  ;;  %v3275_v28 = vld [vmem:[#allocation4 + $0x500] sm:$0xf0] }
 0x2cb   :  { %569 = vmatmul.bf16.vlgmr.msra.gmra.mxu2 %v492_v29  ;;  %v2693_v29 = vor.u32 %v3275_v28, %v2692_v27  ;;  %v2746_v27 = vld [vmem:[#allocation4 + $0x310] sm:$0xf0]  ;;  %v2752_v28 = vld [vmem:[#allocation4 + $0x2c4] sm:$0xf] }
 0x2cd   :  { %843 = vmatpush.bf16.msrb.mxu1 %v2693_v29  ;;  %v3290_v29 = vld [vmem:[#allocation4 + $0x314] sm:$0xf0] }
 0x2d0   :  { %v490_v30 = vpop.f32.mrf.mxu1  ;;  %v590_v31 = vpop.f32.mrf.mxu3 }
 0x2d1   :  { %v607_v36 = vmul.f32 0.125, %v590_v31  ;;  %v2688_v30 = vld [vmem:[#allocation4 + $0x408] sm:$0xf]  ;;  %v3274_v31 = vld [vmem:[#allocation4 + $0x458] sm:$0xf0] }
 0x2d3   :  { %v609_v38 = vsel %vm426_vm0, %v607_v36, -inf }
 0x2d8   :  { %v603_v33 = vpop.f32.mrf.mxu1  ;;  %v592_v34 = vpop.f32.mrf.mxu3 }
 0x2d9   :  { %v608_v35 = vmul.f32 0.125, %v603_v33  ;;  %v2689_v33 = vor.u32 %v3274_v31, %v2688_v30  ;;  %v2684_v34 = vld [vmem:[#allocation4 + $0x360] sm:$0xf] }
 0x2db   :  { %v612_v3 = vsel %vm426_vm0, %v608_v35, -inf  ;;  %844 = vmatpush.bf16.msrb.mxu1 %v2689_v33 }
 0x2dc   :  { %613 = vmax.xlane.f32.xlu2 %v612_v3 }
 0x2e0   :  { %v605_v37 = vpop.f32.mrf.mxu1 }
 0x2e1   :  { %v3272_v37 = vld [vmem:[#allocation4 + $0x308] sm:$0xf0] }
 0x2e4   :  { %610 = vmax.xlane.f32.xlu2 %v609_v38 }
 0x34e   :  { %v570_v40 = vpop.f32.mrf.mxu2 }
 0x34f   :  { %v571_v41 = vadd.f32 %v3409_v39, %v570_v40  ;;  %v614_v42 = vpop.xlane.xlu2 %613  ;;  %v3271_v40 = vld [vmem:[#allocation4 + $0x260] sm:$0xf0] }
 0x350   :  { %v616_v43 = vsub.f32 %v608_v35, %v614_v42  ;;  %v3273_v35 = vld [vmem:[#allocation4 + $0x3b0] sm:$0xf0]  ;;  %v2672_v42 = vld [vmem:[#allocation4 + $0x168] sm:$0xf] }
 0x351   :  { %575 = vst [vmem:[%s3723_s5] sm:$0xff] %v571_v41  ;;  %v2685_v3 = vor.u32 %v3273_v35, %v2684_v34  ;;  %v2732_v35 = vld [vmem:[#allocation4 + $0x214] sm:$0xf] }
 0x352   :  { %v619_v44 = vmul.f32 1.442695, %v616_v43  ;;  %v3270_v43 = vld [vmem:[#allocation4 + $0x1b8] sm:$0xf0] }
 0x353   :  { %845 = vmatpush.bf16.msrb.mxu1 %v2685_v3  ;;  %v3286_v3 = vld [vmem:[#allocation4 + $0x264] sm:$0xf0] }
 0x354   :  { %3428 = vpow2.f32 %v619_v44  ;;  %v2673_v44 = vor.u32 %v3270_v43, %v2672_v42  ;;  %v2733_v43 = vor.u32 %v3286_v3, %v2732_v35 }
 0x356   :  { %v572_v45 = vpop.f32.mrf.mxu2 }
 0x357   :  { %v573_v46 = vadd.f32 %v3409_v39, %v572_v45  ;;  %v611_v47 = vpop.xlane.xlu2 %610  ;;  %v2676_v39 = vld [vmem:[#allocation4 + $0x210] sm:$0xf]  ;;  %v2668_v45 = vld [vmem:[#allocation4 + $0xc0] sm:$0xf] }
 0x358   :  { %v615_v48 = vsub.f32 %v607_v36, %v611_v47  ;;  %v2680_v36 = vld [vmem:[#allocation4 + $0x2b8] sm:$0xf]  ;;  %v2677_v41 = vor.u32 %v3271_v40, %v2676_v39  ;;  %v2734_v39 = vld [vmem:[#allocation4 + $0x268] sm:$0xf0]  ;;  %v2740_v40 = vld [vmem:[#allocation4 + $0x21c] sm:$0xf] }
 0x359   :  { %576 = vst [vmem:[%s3723_s5 + $0x8] sm:$0xff] %v573_v46  ;;  %v2681_v38 = vor.u32 %v3272_v37, %v2680_v36  ;;  %v3269_v46 = vld [vmem:[#allocation4 + $0x110] sm:$0xf0]  ;;  %v2753_v37 = vor.u32 %v3290_v29, %v2752_v28 }
 0x35a   :  { %v3429_v49 = vpop.eup %3428  ;;  %v617_v50 = vmul.f32 1.442695, %v615_v48  ;;  %v2669_v47 = vor.u32 %v3269_v46, %v2668_v45  ;;  %v2664_v48 = vld [vmem:[#allocation4 + $0x18] sm:$0xf] }
 0x35b   :  { %v624_v51 = vsel %vm426_vm0, %v3429_v49, 0.0  ;;  %846 = vmatpush.bf16.msrb.mxu1 %v2681_v38  ;;  %v3285_v38 = vld [vmem:[#allocation4 + $0x218] sm:$0xf] }
 0x35c   :  { %3430 = vpow2.f32 %v617_v50  ;;  %625 = vadd.xlane.f32.xlu0 %v624_v51  ;;  %v3410_v50 = vld [vmem:[%s3722_s4 + $0x5] ss:$0 sm:$0xff] }
 0x35f   :  { %847 = vmatpush.bf16.msrb.mxu1 %v2677_v41  ;;  %v3287_v41 = vld [vmem:[#allocation4 + $0x26c] sm:$0xf0] }
 0x360   :  { %v2741_v46 = vor.u32 %v3287_v41, %v2740_v40 }
 0x362   :  { %v3431_v52 = vpop.eup %3430 }
 0x363   :  { %v621_v53 = vsel %vm426_vm0, %v3431_v52, 0.0  ;;  %848 = vmatpush.bf16.msrb.mxu1 %v2673_v44  ;;  %v2737_v44 = vor.u32 %v3285_v38, %v2734_v39 }
 0x364   :  { %622 = vadd.xlane.f32.xlu1 %v621_v53 }
 0x367   :  { %849 = vmatpush.bf16.msrb.mxu1 %v2669_v47 }
 0x3cf   :  { %v626_v32 = vpop.xlane.xlu0 %625 }
 0x3d0   :  { %3432 = vrcp.f32 %v626_v32  ;;  %v2789_v32 = vor.u32 %v3299_v11, %v2788_v60  ;;  %v2728_v11 = vld [vmem:[#allocation4 + $0x174] sm:$0xf] }
 0x3d2   :  { %1054 = vmatpush.bf16.msrb.mxu0 %v2789_v32  ;;  %v2708_v32 = vld [vmem:[#allocation4 + $0xc4] sm:$0xf] }
 0x3d6   :  { %v3433_v7 = vpop.eup %3432 }
 0x3d7   :  { %v630_v9 = vmul.f32 %v3433_v7, %v3429_v49  ;;  %v623_v10 = vpop.xlane.xlu1 %622  ;;  %v3268_v49 = vld [vmem:[#allocation4 + $0x68] sm:$0xf0]  ;;  %v3296_v7 = vld [vmem:[#allocation4 + $0x464] sm:$0xf0] }
 0x3d8   :  { %3434 = vrcp.f32 %v623_v10  ;;  %v2665_v51 = vor.u32 %v3268_v49, %v2664_v48  ;;  %v2777_v12 = vor.u32 %v3296_v7, %v2776_v5  ;;  %v2716_v5 = vld [vmem:[#allocation4 + $0xcc] sm:$0xf]  ;;  %v2713_v7 = vor.u32 %v3279_v2, %v2710_v4  ;;  %v2822_v2 = vld [vmem:[#allocation4 + $0x4c0] sm:$0xf]  ;;  %v2818_v4 = vld [vmem:[#allocation4 + $0x418] sm:$0xf] }
 0x3d9   :  { %v632_v14 = vpack.c.bf16 %v630_v9, %v630_v9  ;;  %v3292_v9 = vld [vmem:[#allocation4 + $0x3b4] sm:$0xf0] }
 0x3da   :  { %850 = vmatpush.bf16.msrb.mxu1 %v2665_v51  ;;  %v2757_v19 = vor.u32 %v3292_v9, %v2756_v8  ;;  %1055 = vmatpush.bf16.msrb.mxu0 %v2777_v12  ;;  %v2717_v8 = vor.u32 %v3281_v6, %v2716_v5  ;;  %v2696_v9 = vld [vmem:[#allocation4 + $0x1c] sm:$0xf]  ;;  %v3276_v12 = vld [vmem:[#allocation4 + $0x20] sm:$0xf]  ;;  %v3306_v6 = vld [vmem:[#allocation4 + $0x468] sm:$0xf0] }
 0x3db   :  { %2629 = vmatmul.msk.bf16.vlgmr.msrb.gmra.mxu3 %vm426_vm0, %v632_v14  ;;  %v2758_v14 = vld [vmem:[#allocation4 + $0x3b8] sm:$0xf0] }
 0x3dc   :  { %v2761_v20 = vor.u32 %v3291_v13, %v2758_v14  ;;  %1028 = vmatpush.bf16.msrb.mxu2 %v2757_v19  ;;  %v2698_v14 = vld [vmem:[#allocation4 + $0x70] sm:$0xf0]  ;;  %v3411_v19 = vld [vmem:[%s3722_s4 + $0x6] ss:$0 sm:$0xff] }
 0x3de   :  { %v3435_v16 = vpop.eup %3434  ;;  %1042 = vmatpush.bf16.msra.mxu3 %v2761_v20 }
 0x3df   :  { %v629_v26 = vmul.f32 %v3435_v16, %v3431_v52  ;;  %v2764_v16 = vld [vmem:[#allocation4 + $0x36c] sm:$0xf] }
 0x3e1   :  { %v631_v17 = vpack.c.bf16 %v629_v26, %v629_v26  ;;  %v3293_v26 = vld [vmem:[#allocation4 + $0x3bc] sm:$0xf0] }
 0x3e3   :  { %2628 = vmatmul.msk.bf16.vlgmr.msra.gmra.mxu1 %vm426_vm0, %v631_v17 }
 0x45e   :  { %v669_v21 = vpop.f32.mrf.mxu3 }
 0x460   :  { %v650_v22 = vpop.f32.mrf.mxu1 }
 0x461   :  { %v673_v23 = vpack.c.bf16 %v669_v21, %v650_v22  ;;  %v2744_v21 = vld [vmem:[#allocation4 + $0x2bc] sm:$0xf]  ;;  %v3289_v22 = vld [vmem:[#allocation4 + $0x30c] sm:$0xf0] }
 0x462   :  { %v2745_v33 = vor.u32 %v3289_v22, %v2744_v21 }
 0x463   :  { %750 = vmatmul.bf16.vlgmr.msra.gmra.mxu0 %v673_v23 }
 0x464   :  { %1029 = vmatpush.bf16.msrb.mxu2 %v2745_v33 }
 0x466   :  { %v671_v24 = vpop.f32.mrf.mxu3 }
 0x467   :  { %v2765_v24 = vor.u32 %v3293_v26, %v2764_v16  ;;  %v3278_v16 = vld [vmem:[#allocation4 + $0x74] sm:$0xf0]  ;;  %v2701_v26 = vor.u32 %v3276_v12, %v2698_v14  ;;  %v3304_v14 = vld [vmem:[#allocation4 + $0x318] sm:$0xf0] }
 0x468   :  { %v652_v25 = vpop.f32.mrf.mxu1  ;;  %1030 = vmatpush.bf16.msrb.mxu2 %v2733_v43 }
 0x469   :  { %v3288_v25 = vld [vmem:[#allocation4 + $0x2c0] sm:$0xf]  ;;  %1056 = vmatpush.bf16.msrb.mxu0 %v2765_v24 }
 0x46a   :  { %v2749_v34 = vor.u32 %v3288_v25, %v2746_v27  ;;  %v890_v24 = vld [vmem:[%s3722_s4 + $0x7] sm:$0x7] }
 0x46b   :  { %v894_v25 = vperm.slane %v890_v24, 2  ;;  %v893_v29 = vperm.slane %v890_v24, 1  ;;  %v892_v3 = vperm.slane %v890_v24, 0 }
 0x46c   :  { %1043 = vmatpush.bf16.msra.mxu3 %v2749_v34 }
 0x46d   :  { %1057 = vmatpush.bf16.msrb.mxu0 %v2753_v37 }
 0x470   :  { %1044 = vmatpush.bf16.msra.mxu3 %v2737_v44 }
 0x471   :  { %1058 = vmatpush.bf16.msrb.mxu0 %v2741_v46 }
 0x474   :  { %1045 = vmatpush.bf16.msra.mxu3 %v2725_v63 }
 0x478   :  { %1046 = vmatpush.bf16.msra.mxu3 %v2713_v7  ;;  %v2819_v7 = vor.u32 %v3306_v6, %v2818_v4  ;;  %v3323_v6 = vld [vmem:[#allocation4 + $0x518] sm:$0xf0] }
 0x47c   :  { %1047 = vmatpush.bf16.msra.mxu3 %v2701_v26  ;;  %v3303_v26 = vld [vmem:[#allocation4 + $0x270] sm:$0xf0] }
 0x4e0   :  { %v751_v52 = vpop.f32.mrf.mxu0 }
 0x4e1   :  { %v3638_v53 = vadd.f32 %v3410_v50, %v751_v52 }
 0x4e3   :  { %v758_v57 = vmul.f32 %v3638_v53, %v3638_v53 }
 0x4e5   :  { %v760_v0 = vmul.f32 %v758_v57, %v3638_v53  ;;  %v2720_v57 = vld [vmem:[#allocation4 + $0x16c] sm:$0xf] }
 0x4e6   :  { %v2721_v60 = vor.u32 %v3283_v58, %v2720_v57 }
 0x4e7   :  { %v762_v10 = vmul.f32 0.044715, %v760_v0  ;;  %v2729_v0 = vor.u32 %v3284_v62, %v2728_v11 }
 0x4e8   :  { %v753_v15 = vpop.f32.mrf.mxu0  ;;  %1031 = vmatpush.bf16.msrb.mxu2 %v2721_v60 }
 0x4e9   :  { %v764_v17 = vadd.f32 %v762_v10, %v3638_v53  ;;  %v754_v18 = vadd.f32 %v3410_v50, %v753_v15  ;;  %v756_v50 = vmul.f32 0.5, %v3638_v53  ;;  %v2709_v53 = vor.u32 %v3280_v1, %v2708_v32  ;;  %1059 = vmatpush.bf16.msrb.mxu0 %v2729_v0  ;;  %v3277_v10 = vld [vmem:[#allocation4 + $0x6c] sm:$0xf0]  ;;  %v2704_v15 = vld [vmem:[#allocation4 + $0x24] sm:$0xf] }
 0x4ea   :  { %v2697_v13 = vor.u32 %v3277_v10, %v2696_v9  ;;  %v3305_v9 = vld [vmem:[#allocation4 + $0x3c0] sm:$0xf0] }
 0x4eb   :  { %v759_v23 = vmul.f32 %v754_v18, %v754_v18  ;;  %v766_v30 = vmul.f32 0.7978846, %v764_v17  ;;  %v757_v51 = vmul.f32 0.5, %v754_v18  ;;  %v2705_v17 = vor.u32 %v3278_v16, %v2704_v15  ;;  %v2806_v16 = vld [vmem:[#allocation4 + $0x220] sm:$0xf] }
 0x4ec   :  { %1032 = vmatpush.bf16.msrb.mxu2 %v2709_v53  ;;  %v3307_v53 = vld [vmem:[#allocation4 + $0x510] sm:$0xf0] }
 0x4ed   :  { %v761_v31 = vmul.f32 %v759_v23, %v754_v18  ;;  %3436 = vtanh.f32 %v766_v30  ;;  %1060 = vmatpush.bf16.msrb.mxu0 %v2717_v8  ;;  %v2823_v5 = vor.u32 %v3307_v53, %v2822_v2  ;;  %v2814_v8 = vld [vmem:[#allocation4 + $0x370] sm:$0xf] }
 0x4ee   :  { %v2815_v12 = vor.u32 %v3305_v9, %v2814_v8  ;;  %v2882_v8 = vld [vmem:[#allocation4 + $0x420] sm:$0xf]  ;;  %v3322_v9 = vld [vmem:[#allocation4 + $0x470] sm:$0xf0] }
 0x4ef   :  { %v763_v36 = vmul.f32 0.044715, %v761_v31 }
 0x4f0   :  { %1033 = vmatpush.bf16.msrb.mxu2 %v2697_v13  ;;  %v2810_v13 = vld [vmem:[#allocation4 + $0x2c8] sm:$0xf] }
 0x4f1   :  { %v765_v42 = vadd.f32 %v763_v36, %v754_v18  ;;  %1061 = vmatpush.bf16.msrb.mxu0 %v2705_v17  ;;  %v2811_v15 = vor.u32 %v3304_v14, %v2810_v13  ;;  %v3321_v13 = vld [vmem:[#allocation4 + $0x3c8] sm:$0xf0] }
 0x4f3   :  { %v767_v45 = vmul.f32 0.7978846, %v765_v42  ;;  %v3437_v47 = vpop.eup %3436 }
 0x4f4   :  { %v770_v48 = vadd.f32 1.0, %v3437_v47 }
 0x4f5   :  { %3438 = vtanh.f32 %v767_v45 }
 0x4f6   :  { %v772_v54 = vmul.f32 %v770_v48, %v756_v50 }
 0x4fb   :  { %v3439_v49 = vpop.eup %3438 }
 0x4fc   :  { %v771_v52 = vadd.f32 1.0, %v3439_v49 }
 0x4fe   :  { %v773_v55 = vmul.f32 %v771_v52, %v757_v51 }
 0x500   :  { %v774_v56 = vpack.c.bf16 %v773_v55, %v772_v54 }
 0x502   :  { %851 = vmatmul.bf16.vlgmr.msrb.gmra.mxu1 %v774_v56 }
 0x57f   :  { %v852_v18 = vpop.f32.mrf.mxu1 }
 0x580   :  { %v853_v21 = vadd.f32 %v3411_v19, %v852_v18 }
 0x587   :  { %v854_v20 = vpop.f32.mrf.mxu1 }
 0x588   :  { %v855_v22 = vadd.f32 %v3411_v19, %v854_v20  ;;  %v2807_v19 = vor.u32 %v3303_v26, %v2806_v16  ;;  %v3320_v16 = vld [vmem:[#allocation4 + $0x320] sm:$0xf0] }
 0x58a   :  { %v857_v23 = vpack.c.bf16 %v855_v22, %v853_v21 }
 0x58c   :  { %1034 = vmatmul.bf16.vlgmr.msrb.gmra.mxu2 %v857_v23  ;;  %1048 = vmatmul.bf16.vlgmr.msra.gmra.mxu3 %v857_v23 }
 0x58d   :  { %1062 = vmatmul.bf16.vlgmr.msrb.gmra.mxu0 %v857_v23 }
 0x60a   :  { %v1063_v27 = vpop.f32.mrf.mxu0 }
 0x60b   :  { %v1064_v28 = vadd.f32 %v1063_v27, %v894_v25  ;;  %v3302_v27 = vld [vmem:[#allocation4 + $0x1c8] sm:$0xf0] }
 0x60d   :  { %v1124_v30 = vpack.c.bf16 %v1064_v28, %v1064_v28 }
 0x60f   :  { %v1130_v31 = vsel %vm456_vm1, %v1124_v30, 0  ;;  %v1049_v33 = vpop.f32.mrf.mxu3  ;;  %v1035_v34 = vpop.f32.mrf.mxu2  ;;  %v3301_v30 = vld [vmem:[#allocation4 + $0x120] sm:$0xf0] }
 0x610   :  { %v1050_v35 = vadd.f32 %v1049_v33, %v893_v29  ;;  %1139 = vmatpush.bf16.msrb.mxu3 %v1130_v31  ;;  %v1036_v39 = vadd.f32 %v1035_v34, %v892_v3  ;;  %v2794_v33 = vld [vmem:[#allocation4 + $0x28] sm:$0xf]  ;;  %v3300_v34 = vld [vmem:[#allocation4 + $0x78] sm:$0xf0] }
 0x612   :  { %v1070_v36 = vpack.c.bf16 %v1050_v35, %v1050_v35  ;;  %v1065_v37 = vpop.f32.mrf.mxu0  ;;  %v1068_v44 = vpack.c.bf16 %v1036_v39, %v1036_v39  ;;  %v2795_v35 = vor.u32 %v3300_v34, %v2794_v33  ;;  %v3314_v39 = vld [vmem:[#allocation4 + $0x46c] sm:$0xf0]  ;;  %v2946_v34 = vld [vmem:[#allocation4 + $0x4cc] sm:$0xf] }
 0x613   :  { %v1066_v38 = vadd.f32 %v1065_v37, %v894_v25  ;;  %v2802_v25 = vld [vmem:[#allocation4 + $0x178] sm:$0xf]  ;;  %v2850_v37 = vld [vmem:[#allocation4 + $0x41c] sm:$0xf] }
 0x614   :  { %1079 = vmatpush.bf16.xpose.msra.mxu1 %v1070_v36  ;;  %v2803_v28 = vor.u32 %v3302_v27, %v2802_v25  ;;  %v3315_v36 = vld [vmem:[#allocation4 + $0x514] sm:$0xf0]  ;;  %v2858_v27 = vld [vmem:[#allocation4 + $0x30] sm:$0xf] }
 0x615   :  { %v1125_v40 = vpack.c.bf16 %v1066_v38, %v1066_v38 }
 0x617   :  { %v1149_v41 = vsel %vm456_vm1, %v1125_v40, 0  ;;  %v1051_v42 = vpop.f32.mrf.mxu3  ;;  %v1037_v45 = vpop.f32.mrf.mxu2  ;;  %v2851_v40 = vor.u32 %v3314_v39, %v2850_v37  ;;  %v2938_v39 = vld [vmem:[#allocation4 + $0x424] sm:$0xf] }
 0x618   :  { %v1052_v43 = vadd.f32 %v1051_v42, %v893_v29  ;;  %v1038_v47 = vadd.f32 %v1037_v45, %v892_v3  ;;  %v2798_v29 = vld [vmem:[#allocation4 + $0xd0] sm:$0xf]  ;;  %v2854_v3 = vld [vmem:[#allocation4 + $0x4c4] sm:$0xf]  ;;  %v3313_v42 = vld [vmem:[#allocation4 + $0x3c4] sm:$0xf0] }
 0x619   :  { %v2799_v31 = vor.u32 %v3301_v30, %v2798_v29  ;;  %v2855_v38 = vor.u32 %v3315_v36, %v2854_v3  ;;  %v3312_v45 = vld [vmem:[#allocation4 + $0x31c] sm:$0xf0]  ;;  %v3338_v3 = vld [vmem:[#allocation4 + $0x4d0] sm:$0xf] }
 0x61a   :  { %v1071_v46 = vpack.c.bf16 %v1052_v43, %v1052_v43  ;;  %v1069_v48 = vpack.c.bf16 %v1038_v47, %v1038_v47  ;;  %v2838_v47 = vld [vmem:[#allocation4 + $0x224] sm:$0xf]  ;;  %v3413_v29 = vld [vmem:[%s3722_s4 + $0xb] ss:$0 sm:$0xff] }
 0x61b   :  { %1080 = vmatmul.bf16.vlgmr.msra.gmra.mxu1 %v1068_v44  ;;  %1316 = vmatpush.bf16.msra.mxu3 %v2855_v38  ;;  %v2842_v44 = vld [vmem:[#allocation4 + $0x2cc] sm:$0xf]  ;;  %v2948_v38 = vld [vmem:[#allocation4 + $0x520] sm:$0xf0] }
 0x61c   :  { %1158 = vmatpush.bf16.msrb.mxu1 %v1149_v41  ;;  %1092 = vmatpush.bf16.xpose.msra.mxu2 %v1071_v46  ;;  %v2846_v41 = vld [vmem:[#allocation4 + $0x374] sm:$0xf]  ;;  %v2843_v46 = vor.u32 %v3312_v45, %v2842_v44 }
 0x61d   :  { %v2847_v43 = vor.u32 %v3313_v42, %v2846_v41  ;;  %v3337_v41 = vld [vmem:[#allocation4 + $0x474] sm:$0xf0]  ;;  %v3336_v42 = vld [vmem:[#allocation4 + $0x428] sm:$0xf] }
 0x61e   :  { %v2939_v45 = vor.u32 %v3337_v41, %v2938_v39  ;;  %v3414_v39 = vld [vmem:[%s3722_s4 + $0xc] ss:$0 sm:$0xff] }
 0x61f   :  { %1317 = vmatpush.bf16.msra.mxu3 %v2851_v40  ;;  %v2951_v40 = vor.u32 %v3338_v3, %v2948_v38 }
 0x623   :  { %1093 = vmatmul.bf16.vlgmr.msra.gmra.mxu2 %v1069_v48  ;;  %1318 = vmatpush.bf16.msra.mxu3 %v2847_v43  ;;  %v3311_v48 = vld [vmem:[#allocation4 + $0x274] sm:$0xf0]  ;;  %v2940_v43 = vld [vmem:[#allocation4 + $0x478] sm:$0xf0] }
 0x624   :  { %1233 = vmatpush.bf16.msrb.mxu2 %v2823_v5  ;;  %v2886_v5 = vld [vmem:[#allocation4 + $0x4c8] sm:$0xf] }
 0x627   :  { %1319 = vmatpush.bf16.msra.mxu3 %v2843_v46  ;;  %v2943_v46 = vor.u32 %v3336_v42, %v2940_v43 }
 0x628   :  { %1234 = vmatpush.bf16.msrb.mxu2 %v2819_v7  ;;  %v2887_v7 = vor.u32 %v3323_v6, %v2886_v5  ;;  %v2916_v5 = vld [vmem:[#allocation4 + $0x280] sm:$0xf0] }
 0x62a   :  { %1417 = vmatpush.bf16.msra.mxu0 %v2887_v7 }
 0x62c   :  { %1235 = vmatpush.bf16.msrb.mxu2 %v2815_v12  ;;  %v2878_v12 = vld [vmem:[#allocation4 + $0x378] sm:$0xf] }
 0x62d   :  { %v2879_v14 = vor.u32 %v3321_v13, %v2878_v12 }
 0x630   :  { %1236 = vmatpush.bf16.msrb.mxu2 %v2811_v15  ;;  %v2874_v15 = vld [vmem:[#allocation4 + $0x2d0] sm:$0xf] }
 0x631   :  { %v2875_v26 = vor.u32 %v3320_v16, %v2874_v15 }
 0x634   :  { %1237 = vmatpush.bf16.msrb.mxu2 %v2807_v19 }
 0x638   :  { %1238 = vmatpush.bf16.msrb.mxu2 %v2803_v28  ;;  %v3316_v28 = vld [vmem:[#allocation4 + $0x80] sm:$0xf0] }
 0x639   :  { %v2859_v30 = vor.u32 %v3316_v28, %v2858_v27  ;;  %v3326_v28 = vld [vmem:[#allocation4 + $0xe0] sm:$0xf] }
 0x63c   :  { %1239 = vmatpush.bf16.msrb.mxu2 %v2799_v31 }
 0x640   :  { %1240 = vmatpush.bf16.msrb.mxu2 %v2795_v35  ;;  %v3339_v35 = vld [vmem:[#allocation4 + $0x51c] sm:$0xf0] }
 0x641   :  { %v2947_v37 = vor.u32 %v3339_v35, %v2946_v34  ;;  %v3325_v34 = vld [vmem:[#allocation4 + $0x84] sm:$0xf0]  ;;  %v3324_v35 = vld [vmem:[#allocation4 + $0x38] sm:$0xf] }
 0x643   :  { %1534 = vmatpush.bf16.msra.mxu1 %v2947_v37 }
 0x644   :  { %1548 = vmatpush.bf16.msra.mxu2 %v2951_v40 }
 0x647   :  { %1535 = vmatpush.bf16.msra.mxu1 %v2939_v45 }
 0x648   :  { %1549 = vmatpush.bf16.msra.mxu2 %v2943_v46 }
 0x698   :  { %v1081_v49 = vpop.f32.mrf.mxu1 }
 0x699   :  { %v1098_v50 = vmul.f32 0.125, %v1081_v49  ;;  %v2839_v49 = vor.u32 %v3311_v48, %v2838_v47  ;;  %v2930_v47 = vld [vmem:[#allocation4 + $0x37c] sm:$0xf]  ;;  %v3335_v48 = vld [vmem:[#allocation4 + $0x3cc] sm:$0xf0] }
 0x69b   :  { %v1100_v51 = vsel %vm426_vm0, %v1098_v50, -inf  ;;  %1320 = vmatpush.bf16.msra.mxu3 %v2839_v49 }
 0x69c   :  { %1101 = vmax.xlane.f32.xlu2 %v1100_v51 }
 0x6a0   :  { %v1083_v52 = vpop.f32.mrf.mxu1 }
 0x6a6   :  { %v1094_v54 = vpop.f32.mrf.mxu2 }
 0x6a7   :  { %v1099_v55 = vmul.f32 0.125, %v1094_v54 }
 0x6a9   :  { %v1103_v56 = vsel %vm426_vm0, %v1099_v55, -inf }
 0x6aa   :  { %1104 = vmax.xlane.f32.xlu0 %v1103_v56  ;;  %v2834_v56 = vld [vmem:[#allocation4 + $0x17c] sm:$0xf] }
 0x6ae   :  { %v1096_v57 = vpop.f32.mrf.mxu2 }
 0x6af   :  { %v3310_v57 = vld [vmem:[#allocation4 + $0x1cc] sm:$0xf0] }
 0x70f   :  { %v1102_v58 = vpop.xlane.xlu2 %1101 }
 0x710   :  { %v1106_v59 = vsub.f32 %v1098_v50, %v1102_v58  ;;  %v2835_v58 = vor.u32 %v3310_v57, %v2834_v56  ;;  %v2931_v56 = vor.u32 %v3335_v48, %v2930_v47 }
 0x712   :  { %v1108_v60 = vmul.f32 1.442695, %v1106_v59  ;;  %v2830_v59 = vld [vmem:[#allocation4 + $0xd4] sm:$0xf]  ;;  %1321 = vmatpush.bf16.msra.mxu3 %v2835_v58  ;;  %1536 = vmatpush.bf16.msra.mxu1 %v2931_v56 }
 0x713   :  { %v2922_v58 = vld [vmem:[#allocation4 + $0x2d4] sm:$0xf] }
 0x714   :  { %3440 = vpow2.f32 %v1108_v60  ;;  %v3309_v60 = vld [vmem:[#allocation4 + $0x124] sm:$0xf0] }
 0x71a   :  { %v3441_v61 = vpop.eup %3440 }
 0x71b   :  { %v1112_v11 = vsel %vm426_vm0, %v3441_v61, 0.0 }
 0x71c   :  { %1113 = vadd.xlane.f32.xlu1 %v1112_v11  ;;  %v2826_v11 = vld [vmem:[#allocation4 + $0x2c] sm:$0xf] }
 0x71d   :  { %v1105_v62 = vpop.xlane.xlu0 %1104 }
 0x71e   :  { %v1107_v63 = vsub.f32 %v1099_v55, %v1105_v62  ;;  %v3308_v62 = vld [vmem:[#allocation4 + $0x7c] sm:$0xf0] }
 0x720   :  { %v1110_v0 = vmul.f32 1.442695, %v1107_v63  ;;  %v2827_v63 = vor.u32 %v3308_v62, %v2826_v11  ;;  %v2924_v11 = vld [vmem:[#allocation4 + $0x328] sm:$0xf0] }
 0x722   :  { %3442 = vpow2.f32 %v1110_v0 }
 0x728   :  { %v3443_v32 = vpop.eup %3442 }
 0x729   :  { %v1115_v1 = vsel %vm426_vm0, %v3443_v32, 0.0 }
 0x72a   :  { %1116 = vadd.xlane.f32.xlu2 %v1115_v1 }
 0x78f   :  { %v1114_v10 = vpop.xlane.xlu1 %1113 }
 0x790   :  { %3444 = vrcp.f32 %v1114_v10  ;;  %v2883_v10 = vor.u32 %v3322_v9, %v2882_v8 }
 0x792   :  { %1418 = vmatpush.bf16.msra.mxu0 %v2883_v10 }
 0x796   :  { %v3445_v17 = vpop.eup %3444  ;;  %1419 = vmatpush.bf16.msra.mxu0 %v2879_v14 }
 0x797   :  { %v1120_v18 = vmul.f32 %v3445_v17, %v3441_v61  ;;  %v2831_v61 = vor.u32 %v3309_v60, %v2830_v59  ;;  %v2870_v17 = vld [vmem:[#allocation4 + $0x228] sm:$0xf] }
 0x798   :  { %v3333_v59 = vld [vmem:[#allocation4 + $0x324] sm:$0xf0] }
 0x799   :  { %v1122_v20 = vpack.c.bf16 %v1120_v18, %v1120_v18  ;;  %1322 = vmatpush.bf16.msra.mxu3 %v2831_v61  ;;  %v3319_v18 = vld [vmem:[#allocation4 + $0x278] sm:$0xf0]  ;;  %v3332_v61 = vld [vmem:[#allocation4 + $0x2d8] sm:$0xf] }
 0x79a   :  { %1420 = vmatpush.bf16.msra.mxu0 %v2875_v26  ;;  %v2871_v19 = vor.u32 %v3319_v18, %v2870_v17 }
 0x79b   :  { %2790 = vmatmul.msk.bf16.vlgmr.msrb.gmra.mxu3 %vm426_vm0, %v1122_v20  ;;  %v2866_v20 = vld [vmem:[#allocation4 + $0x180] sm:$0xf] }
 0x79d   :  { %v1117_v21 = vpop.xlane.xlu2 %1116  ;;  %1323 = vmatpush.bf16.msra.mxu3 %v2827_v63 }
 0x79e   :  { %3446 = vrcp.f32 %v1117_v21  ;;  %1421 = vmatpush.bf16.msra.mxu0 %v2871_v19  ;;  %v3318_v21 = vld [vmem:[#allocation4 + $0x1d0] sm:$0xf0]  ;;  %v2906_v19 = vld [vmem:[#allocation4 + $0x184] sm:$0xf] }
 0x7a4   :  { %v3447_v22 = vpop.eup %3446 }
 0x7a5   :  { %v1121_v23 = vmul.f32 %v3447_v22, %v3443_v32  ;;  %v3412_v32 = vld [vmem:[%s3722_s4 + $0xa] ss:$0 sm:$0xff]  ;;  %v2867_v22 = vor.u32 %v3318_v21, %v2866_v20  ;;  %v3329_v20 = vld [vmem:[#allocation4 + $0x1d4] sm:$0xf0]  ;;  %v3328_v21 = vld [vmem:[#allocation4 + $0x188] sm:$0xf] }
 0x7a7   :  { %v1123_v24 = vpack.c.bf16 %v1121_v23, %v1121_v23  ;;  %1422 = vmatpush.bf16.msra.mxu0 %v2867_v22  ;;  %v2862_v23 = vld [vmem:[#allocation4 + $0xd8] sm:$0xf]  ;;  %v2907_v22 = vor.u32 %v3329_v20, %v2906_v19  ;;  %v3346_v20 = vld [vmem:[#allocation4 + $0x47c] sm:$0xf0] }
 0x7a9   :  { %2791 = vmatmul.msk.bf16.vlgmr.msrb.gmra.mxu1 %vm426_vm0, %v1123_v24  ;;  %v3317_v24 = vld [vmem:[#allocation4 + $0x128] sm:$0xf0] }
 0x7aa   :  { %v2863_v25 = vor.u32 %v3317_v24, %v2862_v23  ;;  %v2908_v23 = vld [vmem:[#allocation4 + $0x1d8] sm:$0xf0] }
 0x7ab   :  { %v2898_v24 = vld [vmem:[#allocation4 + $0xdc] sm:$0xf]  ;;  %v2911_v27 = vor.u32 %v3328_v21, %v2908_v23  ;;  %v3345_v23 = vld [vmem:[#allocation4 + $0x3d4] sm:$0xf0] }
 0x7ac   :  { %1423 = vmatpush.bf16.msra.mxu0 %v2863_v25  ;;  %v3327_v25 = vld [vmem:[#allocation4 + $0x12c] sm:$0xf0] }
 0x7b0   :  { %1424 = vmatpush.bf16.msra.mxu0 %v2859_v30  ;;  %v2899_v30 = vor.u32 %v3327_v25, %v2898_v24  ;;  %v2972_v25 = vld [vmem:[#allocation4 + $0x2dc] sm:$0xf] }
 0x81e   :  { %v1141_v50 = vpop.f32.mrf.mxu3 }
 0x826   :  { %v1143_v51 = vpop.f32.mrf.mxu3  ;;  %v1160_v52 = vpop.f32.mrf.mxu1 }
 0x827   :  { %v1164_v54 = vpack.c.bf16 %v1160_v52, %v1141_v50  ;;  %v3334_v50 = vld [vmem:[#allocation4 + $0x380] sm:$0xf]  ;;  %v2932_v51 = vld [vmem:[#allocation4 + $0x3d0] sm:$0xf0] }
 0x828   :  { %v2935_v57 = vor.u32 %v3334_v50, %v2932_v51  ;;  %v1562_v50 = vld [vmem:[#allocation2] sm:$0xff] }
 0x829   :  { %1241 = vmatmul.bf16.vlgmr.msrb.gmra.mxu2 %v1164_v54 }
 0x82a   :  { %1550 = vmatpush.bf16.msra.mxu2 %v2935_v57 }
 0x82e   :  { %v1162_v55 = vpop.f32.mrf.mxu1 }
 0x8ac   :  { %v1242_v0 = vpop.f32.mrf.mxu2 }
 0x8ad   :  { %v1243_v2 = vadd.f32 %v3412_v32, %v1242_v0  ;;  %v2923_v0 = vor.u32 %v3333_v59, %v2922_v58 }
 0x8af   :  { %1537 = vmatpush.bf16.msra.mxu1 %v2923_v0 }
 0x8b4   :  { %v1244_v1 = vpop.f32.mrf.mxu2 }
 0x8b5   :  { %v1245_v53 = vadd.f32 %v3412_v32, %v1244_v1  ;;  %v2927_v32 = vor.u32 %v3332_v61, %v2924_v11  ;;  %v2914_v1 = vld [vmem:[#allocation4 + $0x22c] sm:$0xf] }
 0x8b7   :  { %v1247_v4 = vpack.c.bf16 %v1245_v53, %v1243_v2  ;;  %v3331_v2 = vld [vmem:[#allocation4 + $0x27c] sm:$0xf0]  ;;  %1551 = vmatpush.bf16.msra.mxu2 %v2927_v32 }
 0x8b8   :  { %v2915_v7 = vor.u32 %v3331_v2, %v2914_v1 }
 0x8b9   :  { %1324 = vmatmul.bf16.vlgmr.msra.gmra.mxu3 %v1247_v4  ;;  %v3330_v4 = vld [vmem:[#allocation4 + $0x230] sm:$0xf] }
 0x8ba   :  { %v2919_v8 = vor.u32 %v3330_v4, %v2916_v5  ;;  %1538 = vmatpush.bf16.msra.mxu1 %v2915_v7 }
 0x8bc   :  { %1552 = vmatpush.bf16.msra.mxu2 %v2919_v8 }
 0x8be   :  { %1539 = vmatpush.bf16.msra.mxu1 %v2907_v22  ;;  %v2976_v22 = vld [vmem:[#allocation4 + $0x384] sm:$0xf] }
 0x8bf   :  { %v2977_v24 = vor.u32 %v3345_v23, %v2976_v22  ;;  %v3112_v22 = vld [vmem:[#allocation4 + $0x4e4] sm:$0xf] }
 0x8c0   :  { %1553 = vmatpush.bf16.msra.mxu2 %v2911_v27  ;;  %v3344_v27 = vld [vmem:[#allocation4 + $0x32c] sm:$0xf0] }
 0x8c2   :  { %1540 = vmatpush.bf16.msra.mxu1 %v2899_v30  ;;  %v3343_v30 = vld [vmem:[#allocation4 + $0x284] sm:$0xf0] }
 0x93c   :  { %v1325_v31 = vpop.f32.mrf.mxu3 }
 0x93d   :  { %v1326_v33 = vadd.f32 %v3413_v29, %v1325_v31 }
 0x93f   :  { %v1332_v36 = vmul.f32 %v1326_v33, %v1326_v33  ;;  %v1330_v14 = vmul.f32 0.5, %v1326_v33 }
 0x941   :  { %v1334_v44 = vmul.f32 %v1332_v36, %v1326_v33  ;;  %v2892_v36 = vld [vmem:[#allocation4 + $0x88] sm:$0xf0] }
 0x942   :  { %v2895_v37 = vor.u32 %v3324_v35, %v2892_v36 }
 0x943   :  { %v1336_v49 = vmul.f32 0.044715, %v1334_v44  ;;  %v1448_v44 = vld [vmem:[%s3722_s4 + $0xd] sm:$0x3] }
 0x944   :  { %v1327_v52 = vpop.f32.mrf.mxu3  ;;  %v1450_v45 = vperm.slane %v1448_v44, 0 }
 0x945   :  { %v1338_v54 = vadd.f32 %v1336_v49, %v1326_v33  ;;  %v1328_v55 = vadd.f32 %v3413_v29, %v1327_v52  ;;  %v2900_v29 = vld [vmem:[#allocation4 + $0x130] sm:$0xf0]  ;;  %v1451_v49 = vperm.slane %v1448_v44, 1  ;;  %v3341_v44 = vld [vmem:[#allocation4 + $0x134] sm:$0xf0] }
 0x946   :  { %v2903_v31 = vor.u32 %v3326_v28, %v2900_v29  ;;  %v2890_v33 = vld [vmem:[#allocation4 + $0x34] sm:$0xf]  ;;  %v2973_v28 = vor.u32 %v3344_v27, %v2972_v25  ;;  %v3375_v27 = vld [vmem:[#allocation4 + $0x484] sm:$0xf0] }
 0x947   :  { %v1333_v60 = vmul.f32 %v1328_v55, %v1328_v55  ;;  %v1340_v62 = vmul.f32 0.7978846, %v1338_v54  ;;  %v1331_v15 = vmul.f32 0.5, %v1328_v55  ;;  %v2891_v3 = vor.u32 %v3325_v34, %v2890_v33  ;;  %v2968_v29 = vld [vmem:[#allocation4 + $0x234] sm:$0xf] }
 0x948   :  { %1554 = vmatpush.bf16.msra.mxu2 %v2903_v31  ;;  %v2969_v31 = vor.u32 %v3343_v30, %v2968_v29  ;;  %v3092_v25 = vld [vmem:[#allocation4 + $0x434] sm:$0xf] }
 0x949   :  { %v1335_v63 = vmul.f32 %v1333_v60, %v1328_v55  ;;  %3448 = vtanh.f32 %v1340_v62  ;;  %1541 = vmatpush.bf16.msra.mxu1 %v2891_v3  ;;  %v3093_v30 = vor.u32 %v3375_v27, %v3092_v25  ;;  %v3364_v25 = vld [vmem:[#allocation4 + $0x1ec] sm:$0xf0] }
 0x94b   :  { %v1337_v53 = vmul.f32 0.044715, %v1335_v63 }
 0x94c   :  { %1555 = vmatpush.bf16.msra.mxu2 %v2895_v37 }
 0x94d   :  { %v1339_v6 = vadd.f32 %v1337_v53, %v1328_v55  ;;  %v1563_v55 = vpack.c.bf16 %v1562_v50, %v1562_v50 }
 0x94f   :  { %v1341_v9 = vmul.f32 0.7978846, %v1339_v6  ;;  %v3449_v10 = vpop.eup %3448 }
 0x950   :  { %v1344_v12 = vadd.f32 1.0, %v3449_v10 }
 0x951   :  { %3450 = vtanh.f32 %v1341_v9 }
 0x952   :  { %v1346_v26 = vmul.f32 %v1344_v12, %v1330_v14 }
 0x957   :  { %v3451_v13 = vpop.eup %3450 }
 0x958   :  { %v1345_v16 = vadd.f32 1.0, %v3451_v13 }
 0x95a   :  { %v1347_v17 = vmul.f32 %v1345_v16, %v1331_v15 }
 0x95c   :  { %v1348_v18 = vpack.c.bf16 %v1347_v17, %v1346_v26  ;;  %v2984_v26 = vld [vmem:[#allocation4 + $0x4d4] sm:$0xf]  ;;  %v3347_v17 = vld [vmem:[#allocation4 + $0x524] sm:$0xf0] }
 0x95d   :  { %v2985_v19 = vor.u32 %v3347_v17, %v2984_v26  ;;  %v3104_v26 = vld [vmem:[#allocation4 + $0x4dc] sm:$0xf]  ;;  %v3378_v17 = vld [vmem:[#allocation4 + $0x52c] sm:$0xf0] }
 0x95e   :  { %1425 = vmatmul.bf16.vlgmr.msra.gmra.mxu0 %v1348_v18  ;;  %v2980_v18 = vld [vmem:[#allocation4 + $0x42c] sm:$0xf] }
 0x95f   :  { %v2981_v21 = vor.u32 %v3346_v20, %v2980_v18  ;;  %v3377_v18 = vld [vmem:[#allocation4 + $0x4e0] sm:$0xf]  ;;  %v3105_v20 = vor.u32 %v3378_v17, %v3104_v26 }
 0x961   :  { %2011 = vmatpush.bf16.msrb.mxu2 %v3105_v20  ;;  %v3363_v20 = vld [vmem:[#allocation4 + $0x1e4] sm:$0xf0] }
 0x965   :  { %2012 = vmatpush.bf16.msrb.mxu2 %v3093_v30  ;;  %v3360_v30 = vld [vmem:[#allocation4 + $0x13c] sm:$0xf0] }
 0x9db   :  { %v1426_v38 = vpop.f32.mrf.mxu0 }
 0x9dc   :  { %v1427_v41 = vadd.f32 %v3414_v39, %v1426_v38 }
 0x9e3   :  { %v1428_v40 = vpop.f32.mrf.mxu0 }
 0x9e4   :  { %v1429_v42 = vadd.f32 %v3414_v39, %v1428_v40  ;;  %v2964_v40 = vld [vmem:[#allocation4 + $0x18c] sm:$0xf] }
 0x9e6   :  { %v1431_v43 = vpack.c.bf16 %v1429_v42, %v1427_v41  ;;  %v3342_v41 = vld [vmem:[#allocation4 + $0x1dc] sm:$0xf0] }
 0x9e7   :  { %v2965_v42 = vor.u32 %v3342_v41, %v2964_v40  ;;  %v3371_v40 = vld [vmem:[#allocation4 + $0x390] sm:$0xf]  ;;  %v3082_v41 = vld [vmem:[#allocation4 + $0x3e0] sm:$0xf0] }
 0x9e8   :  { %1542 = vmatmul.bf16.vlgmr.msra.gmra.mxu1 %v1431_v43  ;;  %1556 = vmatmul.bf16.vlgmr.msra.gmra.mxu2 %v1431_v43  ;;  %v2960_v43 = vld [vmem:[#allocation4 + $0xe4] sm:$0xf] }
 0xa65   :  { %v1543_v46 = vpop.f32.mrf.mxu1 }
 0xa66   :  { %v1544_v47 = vadd.f32 %v1543_v46, %v1450_v45  ;;  %v2956_v46 = vld [vmem:[#allocation4 + $0x3c] sm:$0xf] }
 0xa68   :  { %v1564_v48 = vpack.c.bf16 %v1544_v47, %v1544_v47  ;;  %v3340_v47 = vld [vmem:[#allocation4 + $0x8c] sm:$0xf0] }
 0xa6a   :  { %1573 = vmatpush.bf16.xpose.msrb.mxu3 %v1564_v48  ;;  %v2957_v48 = vor.u32 %v3340_v47, %v2956_v46 }
 0xa6b   :  { %v1557_v51 = vpop.f32.mrf.mxu2 }
 0xa6c   :  { %v1558_v52 = vadd.f32 %v1557_v51, %v1451_v49 }
 0xa6d   :  { %v1545_v54 = vpop.f32.mrf.mxu1 }
 0xa6e   :  { %v1618_v56 = vpack.c.bf16 %v1558_v52, %v1558_v52  ;;  %v1546_v57 = vadd.f32 %v1545_v54, %v1450_v45  ;;  %v2961_v45 = vor.u32 %v3341_v44, %v2960_v43  ;;  %v3088_v43 = vld [vmem:[#allocation4 + $0x394] sm:$0xf]  ;;  %v3373_v44 = vld [vmem:[#allocation4 + $0x3e4] sm:$0xf0] }
 0xa70   :  { %v1624_v58 = vsel %vm456_vm1, %v1618_v56, 0  ;;  %v1565_v59 = vpack.c.bf16 %v1546_v57, %v1546_v57  ;;  %v3355_v56 = vld [vmem:[#allocation4 + $0x528] sm:$0xf0] }
 0xa71   :  { %1574 = vmatmul.bf16.vlgmr.msrb.gmra.mxu3 %v1563_v55  ;;  %1633 = vmatpush.bf16.msrb.mxu1 %v1624_v58  ;;  %v3012_v58 = vld [vmem:[#allocation4 + $0x430] sm:$0xf] }
 0xa72   :  { %1586 = vmatpush.bf16.xpose.msrb.mxu0 %v1565_v59  ;;  %v3354_v59 = vld [vmem:[#allocation4 + $0x480] sm:$0xf0] }
 0xa73   :  { %v1559_v60 = vpop.f32.mrf.mxu2 }
 0xa74   :  { %v1560_v61 = vadd.f32 %v1559_v60, %v1451_v49  ;;  %v3013_v60 = vor.u32 %v3354_v59, %v3012_v58 }
 0xa76   :  { %v1619_v11 = vpack.c.bf16 %v1560_v61, %v1560_v61  ;;  %v3008_v61 = vld [vmem:[#allocation4 + $0x388] sm:$0xf] }
 0xa78   :  { %v1643_v62 = vsel %vm456_vm1, %v1619_v11, 0  ;;  %v3353_v11 = vld [vmem:[#allocation4 + $0x3d8] sm:$0xf0] }
 0xa79   :  { %1587 = vmatmul.bf16.vlgmr.msrb.gmra.mxu0 %v1563_v55  ;;  %1652 = vmatpush.bf16.msra.mxu3 %v1643_v62  ;;  %v3016_v55 = vld [vmem:[#allocation4 + $0x4d8] sm:$0xf]  ;;  %v3009_v62 = vor.u32 %v3353_v11, %v3008_v61  ;;  %v3056_v11 = vld [vmem:[#allocation4 + $0x23c] sm:$0xf] }
 0xa7a   :  { %1727 = vmatpush.bf16.msra.mxu0 %v2985_v19  ;;  %v3017_v57 = vor.u32 %v3355_v56, %v3016_v55  ;;  %v3070_v55 = vld [vmem:[#allocation4 + $0x338] sm:$0xf0]  ;;  %v3076_v56 = vld [vmem:[#allocation4 + $0x2ec] sm:$0xf] }
 0xa7c   :  { %1828 = vmatpush.bf16.msra.mxu1 %v3017_v57  ;;  %v3370_v57 = vld [vmem:[#allocation4 + $0x33c] sm:$0xf0] }
 0xa7e   :  { %1728 = vmatpush.bf16.msra.mxu0 %v2981_v21  ;;  %v3106_v21 = vld [vmem:[#allocation4 + $0x530] sm:$0xf0] }
 0xa7f   :  { %v3109_v23 = vor.u32 %v3377_v18, %v3106_v21  ;;  %v3362_v21 = vld [vmem:[#allocation4 + $0x198] sm:$0xf] }
 0xa80   :  { %1829 = vmatpush.bf16.msra.mxu1 %v3013_v60 }
 0xa81   :  { %2025 = vmatpush.bf16.msrb.mxu3 %v3109_v23  ;;  %v3046_v23 = vld [vmem:[#allocation4 + $0x1e8] sm:$0xf0] }
 0xa82   :  { %1729 = vmatpush.bf16.msra.mxu0 %v2977_v24  ;;  %v3379_v24 = vld [vmem:[#allocation4 + $0x534] sm:$0xf0]  ;;  %v3049_v27 = vor.u32 %v3362_v21, %v3046_v23 }
 0xa83   :  { %v3113_v29 = vor.u32 %v3379_v24, %v3112_v22  ;;  %v3052_v24 = vld [vmem:[#allocation4 + $0x19c] sm:$0xf] }
 0xa84   :  { %1830 = vmatpush.bf16.msra.mxu1 %v3009_v62  ;;  %v3366_v62 = vld [vmem:[#allocation4 + $0x28c] sm:$0xf0] }
 0xa86   :  { %1730 = vmatpush.bf16.msra.mxu0 %v2973_v28 }
 0xa8a   :  { %1731 = vmatpush.bf16.msra.mxu0 %v2969_v31  ;;  %v3374_v31 = vld [vmem:[#allocation4 + $0x438] sm:$0xf] }
 0xa8e   :  { %1732 = vmatpush.bf16.msra.mxu0 %v2965_v42 }
 0xa92   :  { %1733 = vmatpush.bf16.msra.mxu0 %v2961_v45 }
 0xa96   :  { %1734 = vmatpush.bf16.msra.mxu0 %v2957_v48  ;;  %v3085_v48 = vor.u32 %v3371_v40, %v3082_v41  ;;  %v3022_v41 = vld [vmem:[#allocation4 + $0x98] sm:$0xf0] }
 0xa9a   :  { %2039 = vmatpush.bf16.msrb.mxu0 %v3113_v29  ;;  %v3032_v29 = vld [vmem:[#allocation4 + $0xec] sm:$0xf] }
 0xaf4   :  { %v1575_v63 = vpop.f32.mrf.mxu3 }
 0xaf5   :  { %v1592_v0 = vmul.f32 0.125, %v1575_v63  ;;  %v3004_v63 = vld [vmem:[#allocation4 + $0x2e0] sm:$0xf] }
 0xaf6   :  { %v1588_v32 = vpop.f32.mrf.mxu0 }
 0xaf7   :  { %v1593_v1 = vmul.f32 0.125, %v1588_v32  ;;  %v1594_v2 = vsel %vm426_vm0, %v1592_v0, -inf }
 0xaf8   :  { %1595 = vmax.xlane.f32.xlu1 %v1594_v2  ;;  %v3351_v2 = vld [vmem:[#allocation4 + $0x288] sm:$0xf0] }
 0xaf9   :  { %v1597_v53 = vsel %vm426_vm0, %v1593_v1, -inf }
 0xafa   :  { %1598 = vmax.xlane.f32.xlu0 %v1597_v53 }
 0xafc   :  { %v1577_v4 = vpop.f32.mrf.mxu3 }
 0xafd   :  { %v2996_v4 = vld [vmem:[#allocation4 + $0x190] sm:$0xf] }
 0xafe   :  { %v1590_v5 = vpop.f32.mrf.mxu0 }
 0xaff   :  { %v3350_v5 = vld [vmem:[#allocation4 + $0x1e0] sm:$0xf0] }
 0xb6b   :  { %v1596_v6 = vpop.xlane.xlu1 %1595 }
 0xb6c   :  { %v1600_v7 = vsub.f32 %v1592_v0, %v1596_v6  ;;  %v3352_v0 = vld [vmem:[#allocation4 + $0x330] sm:$0xf0]  ;;  %v2997_v6 = vor.u32 %v3350_v5, %v2996_v4  ;;  %v3057_v5 = vor.u32 %v3366_v62, %v3056_v11 }
 0xb6d   :  { %v1599_v8 = vpop.xlane.xlu0 %1598  ;;  %v3005_v32 = vor.u32 %v3352_v0, %v3004_v63  ;;  %v3077_v0 = vor.u32 %v3370_v57, %v3076_v56 }
 0xb6e   :  { %v1602_v9 = vmul.f32 1.442695, %v1600_v7  ;;  %v1601_v10 = vsub.f32 %v1593_v1, %v1599_v8  ;;  %v3000_v1 = vld [vmem:[#allocation4 + $0x238] sm:$0xf]  ;;  %v2992_v7 = vld [vmem:[#allocation4 + $0xe8] sm:$0xf] }
 0xb6f   :  { %1831 = vmatpush.bf16.msra.mxu1 %v3005_v32  ;;  %v3001_v53 = vor.u32 %v3351_v2, %v3000_v1  ;;  %v3349_v8 = vld [vmem:[#allocation4 + $0x138] sm:$0xf0]  ;;  %v3365_v32 = vld [vmem:[#allocation4 + $0x240] sm:$0xf]  ;;  %v3058_v1 = vld [vmem:[#allocation4 + $0x290] sm:$0xf0] }
 0xb70   :  { %3452 = vpow2.f32 %v1602_v9  ;;  %v1604_v12 = vmul.f32 1.442695, %v1601_v10  ;;  %v2993_v9 = vor.u32 %v3349_v8, %v2992_v7  ;;  %v2988_v10 = vld [vmem:[#allocation4 + $0x40] sm:$0xf]  ;;  %v3064_v2 = vld [vmem:[#allocation4 + $0x244] sm:$0xf] }
 0xb72   :  { %3454 = vpow2.f32 %v1604_v12  ;;  %v3348_v12 = vld [vmem:[#allocation4 + $0x90] sm:$0xf0] }
 0xb73   :  { %1832 = vmatpush.bf16.msra.mxu1 %v3001_v53  ;;  %v3367_v53 = vld [vmem:[#allocation4 + $0x294] sm:$0xf0] }
 0xb74   :  { %v3065_v8 = vor.u32 %v3367_v53, %v3064_v2 }
 0xb76   :  { %v3453_v13 = vpop.eup %3452 }
 0xb77   :  { %v1606_v14 = vsel %vm426_vm0, %v3453_v13, 0.0  ;;  %1833 = vmatpush.bf16.msra.mxu1 %v2997_v6  ;;  %v3061_v6 = vor.u32 %v3365_v32, %v3058_v1 }
 0xb78   :  { %v3455_v15 = vpop.eup %3454  ;;  %1607 = vadd.xlane.f32.xlu0 %v1606_v14  ;;  %v2989_v14 = vor.u32 %v3348_v12, %v2988_v10 }
 0xb79   :  { %v1609_v16 = vsel %vm426_vm0, %v3455_v15, 0.0 }
 0xb7a   :  { %1610 = vadd.xlane.f32.xlu2 %v1609_v16 }
 0xb7b   :  { %1834 = vmatpush.bf16.msra.mxu1 %v2993_v9 }
 0xb7f   :  { %1835 = vmatpush.bf16.msra.mxu1 %v2989_v14 }
 0xbeb   :  { %v1608_v33 = vpop.xlane.xlu0 %1607 }
 0xbec   :  { %3456 = vrcp.f32 %v1608_v33  ;;  %v3094_v33 = vld [vmem:[#allocation4 + $0x488] sm:$0xf0] }
 0xbed   :  { %v1611_v34 = vpop.xlane.xlu2 %1610 }
 0xbee   :  { %3458 = vrcp.f32 %v1611_v34  ;;  %v3100_v34 = vld [vmem:[#allocation4 + $0x43c] sm:$0xf] }
 0xbf2   :  { %v3457_v35 = vpop.eup %3456 }
 0xbf3   :  { %v1614_v3 = vmul.f32 %v3457_v35, %v3453_v13  ;;  %v3415_v13 = vld [vmem:[%s3722_s4 + $0xf] ss:$0 sm:$0xff]  ;;  %v3097_v35 = vor.u32 %v3374_v31, %v3094_v33  ;;  %v3359_v31 = vld [vmem:[#allocation4 + $0xf0] sm:$0xf] }
 0xbf4   :  { %v3459_v36 = vpop.eup %3458  ;;  %v3034_v33 = vld [vmem:[#allocation4 + $0x140] sm:$0xf0] }
 0xbf5   :  { %v1616_v37 = vpack.c.bf16 %v1614_v3, %v1614_v3  ;;  %v1615_v38 = vmul.f32 %v3459_v36, %v3455_v15  ;;  %v3376_v3 = vld [vmem:[#allocation4 + $0x48c] sm:$0xf0]  ;;  %v3080_v36 = vld [vmem:[#allocation4 + $0x38c] sm:$0xf]  ;;  %2026 = vmatpush.bf16.msrb.mxu3 %v3097_v35  ;;  %v3361_v35 = vld [vmem:[#allocation4 + $0x144] sm:$0xf0] }
 0xbf7   :  { %v1617_v39 = vpack.c.bf16 %v1615_v38, %v1615_v38  ;;  %2952 = vmatmul.msk.bf16.vlgmr.msrb.gmra.mxu1 %vm426_vm0, %v1616_v37  ;;  %v3372_v37 = vld [vmem:[#allocation4 + $0x3dc] sm:$0xf0] }
 0xbf8   :  { %v3081_v47 = vor.u32 %v3372_v37, %v3080_v36  ;;  %v3020_v37 = vld [vmem:[#allocation4 + $0x44] sm:$0xf] }
 0xbf9   :  { %2953 = vmatmul.msk.bf16.vlgmr.msra.gmra.mxu3 %vm426_vm0, %v1617_v39  ;;  %v3101_v39 = vor.u32 %v3376_v3, %v3100_v34  ;;  %v3040_v34 = vld [vmem:[#allocation4 + $0xf4] sm:$0xf]  ;;  %v3037_v3 = vor.u32 %v3359_v31, %v3034_v33 }
 0xbfa   :  { %2013 = vmatpush.bf16.msrb.mxu2 %v3081_v47  ;;  %2027 = vmatpush.bf16.msrb.mxu3 %v3085_v48  ;;  %v3041_v36 = vor.u32 %v3361_v35, %v3040_v34  ;;  %v3416_v47 = vld [vmem:[%s3722_s4 + $0x10] ss:$0 sm:$0xff] }
 0xbfb   :  { %2040 = vmatpush.bf16.msrb.mxu0 %v3101_v39  ;;  %v3356_v39 = vld [vmem:[#allocation4 + $0x48] sm:$0xf] }
 0xc74   :  { %v1635_v49 = vpop.f32.mrf.mxu1 }
 0xc7c   :  { %v1637_v50 = vpop.f32.mrf.mxu1  ;;  %v1654_v51 = vpop.f32.mrf.mxu3 }
 0xc7d   :  { %v1658_v52 = vpack.c.bf16 %v1654_v51, %v1635_v49  ;;  %v3068_v49 = vld [vmem:[#allocation4 + $0x2e4] sm:$0xf]  ;;  %v3369_v50 = vld [vmem:[#allocation4 + $0x334] sm:$0xf0] }
 0xc7e   :  { %v3069_v60 = vor.u32 %v3369_v50, %v3068_v49 }
 0xc7f   :  { %1735 = vmatmul.bf16.vlgmr.msra.gmra.mxu0 %v1658_v52  ;;  %v3089_v52 = vor.u32 %v3373_v44, %v3088_v43  ;;  %v3358_v43 = vld [vmem:[#allocation4 + $0x9c] sm:$0xf0]  ;;  %v3025_v44 = vor.u32 %v3356_v39, %v3022_v41 }
 0xc80   :  { %2014 = vmatpush.bf16.msrb.mxu2 %v3069_v60 }
 0xc81   :  { %2041 = vmatpush.bf16.msrb.mxu0 %v3089_v52  ;;  %v1875_v52 = vld [vmem:[%s3722_s4 + $0x11] sm:$0x7] }
 0xc82   :  { %v1878_v57 = vperm.slane %v1875_v52, 1  ;;  %v1877_v62 = vperm.slane %v1875_v52, 0 }
 0xc84   :  { %v1656_v54 = vpop.f32.mrf.mxu3  ;;  %2015 = vmatpush.bf16.msrb.mxu2 %v3057_v5 }
 0xc85   :  { %v3368_v54 = vld [vmem:[#allocation4 + $0x2e8] sm:$0xf]  ;;  %2042 = vmatpush.bf16.msrb.mxu0 %v3077_v0 }
 0xc86   :  { %v3073_v61 = vor.u32 %v3368_v54, %v3070_v55  ;;  %v1879_v54 = vperm.slane %v1875_v52, 2 }
 0xc88   :  { %2028 = vmatpush.bf16.msrb.mxu3 %v3073_v61 }
 0xc89   :  { %2043 = vmatpush.bf16.msrb.mxu0 %v3065_v8 }
 0xc8c   :  { %2029 = vmatpush.bf16.msrb.mxu3 %v3061_v6 }
 0xc90   :  { %2030 = vmatpush.bf16.msrb.mxu3 %v3049_v27 }
 0xc94   :  { %2031 = vmatpush.bf16.msrb.mxu3 %v3037_v3 }
 0xc98   :  { %2032 = vmatpush.bf16.msrb.mxu3 %v3025_v44 }
 0xcfc   :  { %v1736_v15 = vpop.f32.mrf.mxu0 }
 0xcfd   :  { %v3682_v16 = vadd.f32 %v3415_v13, %v1736_v15 }
 0xcff   :  { %v1743_v19 = vmul.f32 %v3682_v16, %v3682_v16 }
 0xd01   :  { %v1745_v28 = vmul.f32 %v1743_v19, %v3682_v16  ;;  %v3044_v19 = vld [vmem:[#allocation4 + $0x194] sm:$0xf] }
 0xd02   :  { %v3045_v22 = vor.u32 %v3363_v20, %v3044_v19 }
 0xd03   :  { %v1747_v38 = vmul.f32 0.044715, %v1745_v28  ;;  %v3053_v28 = vor.u32 %v3364_v25, %v3052_v24 }
 0xd04   :  { %v1738_v42 = vpop.f32.mrf.mxu0  ;;  %2016 = vmatpush.bf16.msrb.mxu2 %v3045_v22 }
 0xd05   :  { %v1749_v45 = vadd.f32 %v1747_v38, %v3682_v16  ;;  %v1739_v46 = vadd.f32 %v3415_v13, %v1738_v42  ;;  %v1741_v13 = vmul.f32 0.5, %v3682_v16  ;;  %v3033_v16 = vor.u32 %v3360_v30, %v3032_v29  ;;  %2044 = vmatpush.bf16.msrb.mxu0 %v3053_v28  ;;  %v3357_v38 = vld [vmem:[#allocation4 + $0x94] sm:$0xf0]  ;;  %v3028_v42 = vld [vmem:[#allocation4 + $0x4c] sm:$0xf] }
 0xd06   :  { %v3021_v40 = vor.u32 %v3357_v38, %v3020_v37  ;;  %v3387_v37 = vld [vmem:[#allocation4 + $0x538] sm:$0xf0]  ;;  %v3142_v38 = vld [vmem:[#allocation4 + $0x440] sm:$0xf] }
 0xd07   :  { %v1744_v51 = vmul.f32 %v1739_v46, %v1739_v46  ;;  %v1751_v58 = vmul.f32 0.7978846, %v1749_v45  ;;  %v1742_v14 = vmul.f32 0.5, %v1739_v46  ;;  %v3029_v45 = vor.u32 %v3358_v43, %v3028_v42  ;;  %v3138_v42 = vld [vmem:[#allocation4 + $0x398] sm:$0xf] }
 0xd08   :  { %2017 = vmatpush.bf16.msrb.mxu2 %v3033_v16  ;;  %v3385_v43 = vld [vmem:[#allocation4 + $0x3e8] sm:$0xf0] }
 0xd09   :  { %v1746_v59 = vmul.f32 %v1744_v51, %v1739_v46  ;;  %3460 = vtanh.f32 %v1751_v58  ;;  %2045 = vmatpush.bf16.msrb.mxu0 %v3041_v36  ;;  %v3146_v36 = vld [vmem:[#allocation4 + $0x4e8] sm:$0xf] }
 0xd0a   :  { %v3147_v39 = vor.u32 %v3387_v37, %v3146_v36 }
 0xd0b   :  { %v1748_v63 = vmul.f32 0.044715, %v1746_v59 }
 0xd0c   :  { %2018 = vmatpush.bf16.msrb.mxu2 %v3021_v40  ;;  %v3386_v40 = vld [vmem:[#allocation4 + $0x490] sm:$0xf0] }
 0xd0d   :  { %v1750_v4 = vadd.f32 %v1748_v63, %v1739_v46  ;;  %2046 = vmatpush.bf16.msrb.mxu0 %v3029_v45  ;;  %v3143_v41 = vor.u32 %v3386_v40, %v3142_v38  ;;  %v3139_v45 = vor.u32 %v3385_v43, %v3138_v42  ;;  %v3403_v40 = vld [vmem:[#allocation4 + $0x518] sm:$0xf0]  ;;  %v3206_v42 = vld [vmem:[#allocation4 + $0x420] sm:$0xf]  ;;  %v3402_v43 = vld [vmem:[#allocation4 + $0x470] sm:$0xf0] }
 0xd0f   :  { %v1752_v7 = vmul.f32 0.7978846, %v1750_v4  ;;  %v3461_v9 = vpop.eup %3460 }
 0xd10   :  { %v1755_v10 = vadd.f32 1.0, %v3461_v9 }
 0xd11   :  { %3462 = vtanh.f32 %v1752_v7 }
 0xd12   :  { %v1757_v26 = vmul.f32 %v1755_v10, %v1741_v13 }
 0xd17   :  { %v3463_v12 = vpop.eup %3462 }
 0xd18   :  { %v1756_v15 = vadd.f32 1.0, %v3463_v12  ;;  %v2053_v12 = vlaneseq }
 0xd1a   :  { %v1758_v17 = vmul.f32 %v1756_v15, %v1742_v14  ;;  %v2054_v13 = vand.u32 127, %v2053_v12  ;;  %v3532_v15 = vmov 0.0  }
 0xd1c   :  { %v1759_v18 = vpack.c.bf16 %v1758_v17, %v1757_v26  ;;  %vm2055_vm2 = vcmp.ge.s32.totalorder %v2054_v13, 7  ;;  %v3166_v13 = vld [vmem:[#allocation4 + $0x2cc] sm:$0xf] }
 0xd1d   :  { %v2056_v26 = vsel %vm2055_vm2, -1e+09, %v3532_v15 }
 0xd1e   :  { %1836 = vmatmul.bf16.vlgmr.msra.gmra.mxu1 %v1759_v18 }
 0xd9b   :  { %v1837_v46 = vpop.f32.mrf.mxu1 }
 0xd9c   :  { %v1838_v49 = vadd.f32 %v3416_v47, %v1837_v46  ;;  %v3134_v46 = vld [vmem:[#allocation4 + $0x2f0] sm:$0xf] }
 0xda3   :  { %v1839_v48 = vpop.f32.mrf.mxu1 }
 0xda4   :  { %v1840_v50 = vadd.f32 %v3416_v47, %v1839_v48  ;;  %v3384_v47 = vld [vmem:[#allocation4 + $0x340] sm:$0xf0] }
 0xda5   :  { %v3135_v48 = vor.u32 %v3384_v47, %v3134_v46  ;;  %v3401_v46 = vld [vmem:[#allocation4 + $0x3c8] sm:$0xf0] }
 0xda6   :  { %v1842_v51 = vpack.c.bf16 %v1840_v50, %v1838_v49  ;;  %v3130_v49 = vld [vmem:[#allocation4 + $0x248] sm:$0xf]  ;;  %v3383_v50 = vld [vmem:[#allocation4 + $0x298] sm:$0xf0] }
 0xda8   :  { %2019 = vmatmul.bf16.vlgmr.msrb.gmra.mxu2 %v1842_v51  ;;  %2033 = vmatmul.bf16.vlgmr.msrb.gmra.mxu3 %v1842_v51 }
 0xda9   :  { %2047 = vmatmul.bf16.vlgmr.msrb.gmra.mxu0 %v1842_v51 }
 0xe26   :  { %v2048_v55 = vpop.f32.mrf.mxu0 }
 0xe27   :  { %v2049_v56 = vadd.f32 %v2048_v55, %v1879_v54 }
 0xe29   :  { %v2115_v58 = vpack.c.bf16 %v2049_v56, %v2049_v56 }
 0xe2b   :  { %v2121_v59 = vsel %vm456_vm1, %v2115_v58, 0  ;;  %v2034_v60 = vpop.f32.mrf.mxu3  ;;  %v2020_v61 = vpop.f32.mrf.mxu2 }
 0xe2c   :  { %v2035_v11 = vadd.f32 %v2034_v60, %v1878_v57  ;;  %2130 = vmatpush.bf16.msra.mxu3 %v2121_v59  ;;  %v2021_v1 = vadd.f32 %v2020_v61, %v1877_v62  ;;  %v3126_v60 = vld [vmem:[#allocation4 + $0x1a0] sm:$0xf]  ;;  %v3382_v61 = vld [vmem:[#allocation4 + $0x1f0] sm:$0xf0] }
 0xe2e   :  { %v2059_v63 = vpack.c.bf16 %v2035_v11, %v2035_v11  ;;  %v2050_v0 = vpop.f32.mrf.mxu0  ;;  %v2057_v6 = vpack.c.bf16 %v2021_v1, %v2021_v1  ;;  %v3127_v11 = vor.u32 %v3382_v61, %v3126_v60  ;;  %v3380_v1 = vld [vmem:[#allocation4 + $0xa0] sm:$0xf0]  ;;  %v3182_v61 = vld [vmem:[#allocation4 + $0x30] sm:$0xf] }
 0xe2f   :  { %v2051_v32 = vadd.f32 %v2050_v0, %v1879_v54  ;;  %v3131_v54 = vor.u32 %v3383_v50, %v3130_v49  ;;  %v3400_v49 = vld [vmem:[#allocation4 + $0x320] sm:$0xf0] }
 0xe30   :  { %2068 = vmatpush.bf16.xpose.msrb.mxu1 %v2059_v63  ;;  %v3381_v63 = vld [vmem:[#allocation4 + $0x148] sm:$0xf0] }
 0xe31   :  { %v2116_v2 = vpack.c.bf16 %v2051_v32, %v2051_v32  ;;  %v3118_v32 = vld [vmem:[#allocation4 + $0x50] sm:$0xf] }
 0xe33   :  { %v2140_v53 = vsel %vm456_vm1, %v2116_v2, 0  ;;  %v2036_v4 = vpop.f32.mrf.mxu3  ;;  %v2022_v7 = vpop.f32.mrf.mxu2  ;;  %v3119_v2 = vor.u32 %v3380_v1, %v3118_v32 }
 0xe34   :  { %v2037_v5 = vadd.f32 %v2036_v4, %v1878_v57  ;;  %v2023_v9 = vadd.f32 %v2022_v7, %v1877_v62  ;;  %v3122_v62 = vld [vmem:[#allocation4 + $0xf8] sm:$0xf]  ;;  %v3394_v7 = vld [vmem:[#allocation4 + $0x46c] sm:$0xf0] }
 0xe35   :  { %v3123_v0 = vor.u32 %v3381_v63, %v3122_v62  ;;  %v3395_v4 = vld [vmem:[#allocation4 + $0x514] sm:$0xf0]  ;;  %v3418_v62 = vld [vmem:[%s3722_s4 + $0xb] ss:$0 sm:$0xff] }
 0xe36   :  { %v2060_v8 = vpack.c.bf16 %v2037_v5, %v2037_v5  ;;  %v2058_v10 = vpack.c.bf16 %v2023_v9, %v2023_v9  ;;  %v3174_v5 = vld [vmem:[#allocation4 + $0x41c] sm:$0xf]  ;;  %v3170_v9 = vld [vmem:[#allocation4 + $0x374] sm:$0xf] }
 0xe37   :  { %2069 = vmatmul.bf16.vlgmr.msrb.gmra.mxu1 %v2057_v6 }
 0xe38   :  { %2149 = vmatpush.bf16.msra.mxu1 %v2140_v53  ;;  %2081 = vmatpush.bf16.xpose.msra.mxu2 %v2060_v8  ;;  %v3178_v53 = vld [vmem:[#allocation4 + $0x4c4] sm:$0xf]  ;;  %v3175_v8 = vor.u32 %v3394_v7, %v3174_v5 }
 0xe39   :  { %v3179_v6 = vor.u32 %v3395_v4, %v3178_v53 }
 0xe3b   :  { %2307 = vmatpush.bf16.msrb.mxu3 %v3179_v6 }
 0xe3f   :  { %2082 = vmatmul.bf16.vlgmr.msra.gmra.mxu2 %v2058_v10  ;;  %v3393_v10 = vld [vmem:[#allocation4 + $0x3c4] sm:$0xf0]  ;;  %2308 = vmatpush.bf16.msrb.mxu3 %v3175_v8 }
 0xe40   :  { %2224 = vmatpush.bf16.msrb.mxu2 %v3147_v39  ;;  %v3171_v12 = vor.u32 %v3393_v10, %v3170_v9  ;;  %v3210_v39 = vld [vmem:[#allocation4 + $0x4c8] sm:$0xf] }
 0xe43   :  { %2309 = vmatpush.bf16.msrb.mxu3 %v3171_v12 }
 0xe44   :  { %2225 = vmatpush.bf16.msrb.mxu2 %v3143_v41  ;;  %v3211_v41 = vor.u32 %v3403_v40, %v3210_v39 }
 0xe46   :  { %2408 = vmatpush.bf16.msra.mxu0 %v3211_v41 }
 0xe48   :  { %2226 = vmatpush.bf16.msrb.mxu2 %v3139_v45  ;;  %v3202_v45 = vld [vmem:[#allocation4 + $0x378] sm:$0xf] }
 0xe49   :  { %v3203_v47 = vor.u32 %v3401_v46, %v3202_v45 }
 0xe4c   :  { %2227 = vmatpush.bf16.msrb.mxu2 %v3135_v48  ;;  %v3198_v48 = vld [vmem:[#allocation4 + $0x2d0] sm:$0xf] }
 0xe4d   :  { %v3199_v50 = vor.u32 %v3400_v49, %v3198_v48 }
 0xe50   :  { %2228 = vmatpush.bf16.msrb.mxu2 %v3131_v54 }
 0xe54   :  { %2229 = vmatpush.bf16.msrb.mxu2 %v3127_v11  ;;  %v3396_v11 = vld [vmem:[#allocation4 + $0x80] sm:$0xf0] }
 0xe55   :  { %v3183_v63 = vor.u32 %v3396_v11, %v3182_v61 }
 0xe58   :  { %2230 = vmatpush.bf16.msrb.mxu2 %v3123_v0 }
 0xe5c   :  { %2231 = vmatpush.bf16.msrb.mxu2 %v3119_v2 }
 0xeb4   :  { %v2070_v14 = vpop.f32.mrf.mxu1 }
 0xeb5   :  { %v2087_v17 = vmul.f32 0.125, %v2070_v14  ;;  %v3392_v14 = vld [vmem:[#allocation4 + $0x31c] sm:$0xf0] }
 0xeb6   :  { %v3167_v15 = vor.u32 %v3392_v14, %v3166_v13 }
 0xeb7   :  { %v2089_v18 = vadd.f32 %v2087_v17, %v2056_v26  ;;  %v3391_v17 = vld [vmem:[#allocation4 + $0x274] sm:$0xf0] }
 0xeb8   :  { %2310 = vmatpush.bf16.msrb.mxu3 %v3167_v15 }
 0xeb9   :  { %v2091_v19 = vsel %vm426_vm0, %v2089_v18, -inf }
 0xeba   :  { %2092 = vmax.xlane.f32.xlu1 %v2091_v19 }
 0xebc   :  { %v2072_v20 = vpop.f32.mrf.mxu1 }
 0xec2   :  { %v2083_v21 = vpop.f32.mrf.mxu2 }
 0xec3   :  { %v2088_v22 = vmul.f32 0.125, %v2083_v21 }
 0xec5   :  { %v2090_v23 = vadd.f32 %v2088_v22, %v2056_v26  ;;  %v3162_v26 = vld [vmem:[#allocation4 + $0x224] sm:$0xf] }
 0xec7   :  { %v2094_v24 = vsel %vm426_vm0, %v2090_v23, -inf }
 0xec8   :  { %2095 = vmax.xlane.f32.xlu2 %v2094_v24  ;;  %v3158_v24 = vld [vmem:[#allocation4 + $0x17c] sm:$0xf] }
 0xeca   :  { %v2085_v25 = vpop.f32.mrf.mxu2 }
 0xecb   :  { %v3390_v25 = vld [vmem:[#allocation4 + $0x1cc] sm:$0xf0] }
 0xf2d   :  { %v2093_v27 = vpop.xlane.xlu1 %2092 }
 0xf2e   :  { %v2097_v28 = vsub.f32 %v2089_v18, %v2093_v27  ;;  %v3163_v18 = vor.u32 %v3391_v17, %v3162_v26  ;;  %v3159_v27 = vor.u32 %v3390_v25, %v3158_v24 }
 0xf30   :  { %v2099_v29 = vmul.f32 1.442695, %v2097_v28  ;;  %2311 = vmatpush.bf16.msrb.mxu3 %v3163_v18  ;;  %v3154_v28 = vld [vmem:[#allocation4 + $0xd4] sm:$0xf] }
 0xf32   :  { %3464 = vpow2.f32 %v2099_v29  ;;  %v3389_v29 = vld [vmem:[#allocation4 + $0x124] sm:$0xf0] }
 0xf34   :  { %2312 = vmatpush.bf16.msrb.mxu3 %v3159_v27 }
 0xf38   :  { %v3465_v30 = vpop.eup %3464 }
 0xf39   :  { %v2103_v31 = vsel %vm426_vm0, %v3465_v30, 0.0 }
 0xf3a   :  { %2104 = vadd.xlane.f32.xlu0 %v2103_v31  ;;  %v3150_v31 = vld [vmem:[#allocation4 + $0x2c] sm:$0xf] }
 0xf3b   :  { %v2096_v16 = vpop.xlane.xlu2 %2095 }
 0xf3c   :  { %v2098_v33 = vsub.f32 %v2090_v23, %v2096_v16  ;;  %v3388_v16 = vld [vmem:[#allocation4 + $0x7c] sm:$0xf0] }
 0xf3e   :  { %v2101_v34 = vmul.f32 1.442695, %v2098_v33  ;;  %v3151_v33 = vor.u32 %v3388_v16, %v3150_v31 }
 0xf40   :  { %3466 = vpow2.f32 %v2101_v34 }
 0xf46   :  { %v3467_v35 = vpop.eup %3466 }
 0xf47   :  { %v2106_v3 = vsel %vm426_vm0, %v3467_v35, 0.0 }
 0xf48   :  { %2107 = vadd.xlane.f32.xlu1 %v2106_v3 }
 0xfad   :  { %v2105_v44 = vpop.xlane.xlu0 %2104 }
 0xfae   :  { %3468 = vrcp.f32 %v2105_v44  ;;  %v3207_v44 = vor.u32 %v3402_v43, %v3206_v42 }
 0xfb0   :  { %2409 = vmatpush.bf16.msra.mxu0 %v3207_v44 }
 0xfb4   :  { %v3469_v51 = vpop.eup %3468  ;;  %2410 = vmatpush.bf16.msra.mxu0 %v3203_v47 }
 0xfb5   :  { %v2111_v52 = vmul.f32 %v3469_v51, %v3465_v30  ;;  %v3155_v30 = vor.u32 %v3389_v29, %v3154_v28  ;;  %v3194_v51 = vld [vmem:[#allocation4 + $0x228] sm:$0xf] }
 0xfb7   :  { %v2113_v55 = vpack.c.bf16 %v2111_v52, %v2111_v52  ;;  %2313 = vmatpush.bf16.msrb.mxu3 %v3155_v30  ;;  %v3399_v52 = vld [vmem:[#allocation4 + $0x278] sm:$0xf0] }
 0xfb8   :  { %2411 = vmatpush.bf16.msra.mxu0 %v3199_v50  ;;  %v3195_v54 = vor.u32 %v3399_v52, %v3194_v51 }
 0xfb9   :  { %3114 = vmatmul.msk.bf16.vlgmr.msra.gmra.mxu3 %vm426_vm0, %v2113_v55  ;;  %v3190_v55 = vld [vmem:[#allocation4 + $0x180] sm:$0xf] }
 0xfbb   :  { %v2108_v56 = vpop.xlane.xlu1 %2107  ;;  %2314 = vmatpush.bf16.msrb.mxu3 %v3151_v33 }
 0xfbc   :  { %3470 = vrcp.f32 %v2108_v56  ;;  %2412 = vmatpush.bf16.msra.mxu0 %v3195_v54  ;;  %v3398_v56 = vld [vmem:[#allocation4 + $0x1d0] sm:$0xf0] }
 0xfc2   :  { %v3471_v57 = vpop.eup %3470 }
 0xfc3   :  { %v2112_v58 = vmul.f32 %v3471_v57, %v3467_v35  ;;  %v3417_v35 = vld [vmem:[%s3722_s4 + $0x14] ss:$0 sm:$0xff]  ;;  %v3191_v57 = vor.u32 %v3398_v56, %v3190_v55 }
 0xfc5   :  { %v2114_v59 = vpack.c.bf16 %v2112_v58, %v2112_v58  ;;  %2413 = vmatpush.bf16.msra.mxu0 %v3191_v57  ;;  %v3186_v58 = vld [vmem:[#allocation4 + $0xd8] sm:$0xf] }
 0xfc7   :  { %3115 = vmatmul.msk.bf16.vlgmr.msra.gmra.mxu1 %vm426_vm0, %v2114_v59  ;;  %v3397_v59 = vld [vmem:[#allocation4 + $0x128] sm:$0xf0] }
 0xfc8   :  { %v3187_v60 = vor.u32 %v3397_v59, %v3186_v58 }
 0xfca   :  { %2414 = vmatpush.bf16.msra.mxu0 %v3187_v60 }
 0xfce   :  { %2415 = vmatpush.bf16.msra.mxu0 %v3183_v63 }
0x103c   :  { %v2132_v19 = vpop.f32.mrf.mxu3 }
0x1044   :  { %v2134_v20 = vpop.f32.mrf.mxu3  ;;  %v2151_v21 = vpop.f32.mrf.mxu1 }
0x1045   :  { %v2155_v22 = vpack.c.bf16 %v2151_v21, %v2132_v19 }
0x1047   :  { %2232 = vmatmul.bf16.vlgmr.msrb.gmra.mxu2 %v2155_v22 }
0x104c   :  { %v2153_v23 = vpop.f32.mrf.mxu1 }
0x104d   :  { %v3419_v23 = vld [vmem:[%s3722_s4 + $0xc] ss:$0 sm:$0xff] }
0x10ca   :  { %v2233_v34 = vpop.f32.mrf.mxu2 }
0x10cb   :  { %v2234_v36 = vadd.f32 %v3417_v35, %v2233_v34 }
0x10d2   :  { %v2235_v3 = vpop.f32.mrf.mxu2 }
0x10d3   :  { %v2236_v37 = vadd.f32 %v3417_v35, %v2235_v3 }
0x10d5   :  { %v2238_v38 = vpack.c.bf16 %v2236_v37, %v2234_v36 }
0x10d7   :  { %2315 = vmatmul.bf16.vlgmr.msrb.gmra.mxu3 %v2238_v38 }
0x115a   :  { %v2316_v0 = vpop.f32.mrf.mxu3 }
0x115b   :  { %v2317_v32 = vadd.f32 %v3418_v62, %v2316_v0 }
0x115d   :  { %v2323_v1 = vmul.f32 %v2317_v32, %v2317_v32  ;;  %v2321_v17 = vmul.f32 0.5, %v2317_v32 }
0x115f   :  { %v2325_v2 = vmul.f32 %v2323_v1, %v2317_v32 }
0x1161   :  { %v2327_v53 = vmul.f32 0.044715, %v2325_v2 }
0x1162   :  { %v2318_v4 = vpop.f32.mrf.mxu3 }
0x1163   :  { %v2329_v5 = vadd.f32 %v2327_v53, %v2317_v32  ;;  %v2319_v6 = vadd.f32 %v3418_v62, %v2318_v4 }
0x1165   :  { %v2324_v7 = vmul.f32 %v2319_v6, %v2319_v6  ;;  %v2331_v8 = vmul.f32 0.7978846, %v2329_v5  ;;  %v2322_v18 = vmul.f32 0.5, %v2319_v6 }
0x1167   :  { %v2326_v9 = vmul.f32 %v2324_v7, %v2319_v6  ;;  %3472 = vtanh.f32 %v2331_v8 }
0x1169   :  { %v2328_v10 = vmul.f32 0.044715, %v2326_v9 }
0x116b   :  { %v2330_v12 = vadd.f32 %v2328_v10, %v2319_v6 }
0x116d   :  { %v2332_v13 = vmul.f32 0.7978846, %v2330_v12  ;;  %v3473_v14 = vpop.eup %3472 }
0x116e   :  { %v2335_v15 = vadd.f32 1.0, %v3473_v14 }
0x116f   :  { %3474 = vtanh.f32 %v2332_v13 }
0x1170   :  { %v2337_v20 = vmul.f32 %v2335_v15, %v2321_v17 }
0x1175   :  { %v3475_v26 = vpop.eup %3474 }
0x1176   :  { %v2336_v19 = vadd.f32 1.0, %v3475_v26 }
0x1178   :  { %v2338_v21 = vmul.f32 %v2336_v19, %v2322_v18 }
0x117a   :  { %v2339_v22 = vpack.c.bf16 %v2338_v21, %v2337_v20 }
0x117c   :  { %2416 = vmatmul.bf16.vlgmr.msra.gmra.mxu0 %v2339_v22 }
0x11f9   :  { %v2417_v24 = vpop.f32.mrf.mxu0 }
0x11fa   :  { %v2418_v25 = vadd.f32 %v3419_v23, %v2417_v24 }
0x11fc   :  { %2422 = vst [vmem:[%s3724_s6] sm:$0xff] %v2418_v25 }
0x1201   :  { %v2419_v27 = vpop.f32.mrf.mxu0 }
0x1202   :  { %v2420_v28 = vadd.f32 %v3419_v23, %v2419_v27 }
0x1204   :  { %2423 = vst [vmem:[%s3724_s6 + $0x8] sm:$0xff] %v2420_v28 }
0x1205   :  { %2432 = vsyncpa [#allocation3], 1 }
0x1206   :  { %2433 = vsyncpa [#allocation5], 1 }

</bundles_post_ra>
